<compile_context>
chip_gen: v7x
topology: tpu7x:2x2x1
jax: 0.10.0
libtpu: 0.0.40
codegen_flags: <defaults>
</compile_context>

<pallas_src>
import functools

import jax
import jax.numpy as jnp
from jax.experimental import pallas as pl
from jax.experimental.pallas import tpu as pltpu

LANE = 128     # last dims padded to a multiple of this (lane-dense stores)
SUBLANE = 8    # batch padded to a multiple of this (full-vreg sublanes)


def _round_up(x, m):
    return (x + m - 1) // m * m


# ----------------------------------------------------------------------------
# Pallas kernel: fused fwd+bwd LSTM recurrence over one time chunk.
# ----------------------------------------------------------------------------
def _bilstm_chunk_kernel(xpf_ref, xpb_ref, whf_ref, whb_ref,
                         hseqf_ref, hseqb_ref,
                         hf, cf, hb, cb):
    """Grid = (batch_shards, time_chunks). Each invocation advances BOTH
    directions over one time chunk of one batch shard, carrying h/c in scratch.

    xpf_ref/xpb_ref : (ts, Bb, 4*Hp) bf16  precomputed x@W_ih + b per direction
                      (backward chunks arrive in reversed chunk order)
    whf_ref/whb_ref : (Hp, 4*Hp) f32       recurrent weights
    hseqf/hseqb_ref : (ts, Bb, Hp) f32     per-step hidden states, natural time order
    hf,cf,hb,cb     : (Bb, Hp) f32         carried state (persists across time chunks)
    """
    ts = xpf_ref.shape[0]
    Hp = hf.shape[-1]

    # Fresh state at the start of each batch shard's time sweep.
    @pl.when(pl.program_id(1) == 0)
    def _init():
        z = jnp.zeros_like(hf)
        hf[...] = z
        cf[...] = z
        hb[...] = z
        cb[...] = z

    whf = whf_ref[...]          # loaded once per chunk, reused every step
    whb = whb_ref[...]

    def cell(gates, c_prev):
        # gate layout (i, f, o, g): one contiguous sigmoid slab + one tanh slab
        s = jax.nn.sigmoid(gates[:, : 3 * Hp])
        g = jnp.tanh(gates[:, 3 * Hp:])
        i, f, o = s[:, :Hp], s[:, Hp:2 * Hp], s[:, 2 * Hp:]
        c_new = f * c_prev + i * g
        h_new = o * jnp.tanh(c_new)
        return h_new, c_new

    def step(t, carry):
        tf = t               # forward walks the chunk front-to-back (scalar int
        tb = ts - 1 - t      # math only; backward walks it back-to-front)
        # Two independent recurrent matmuls per step keep two h-chains in
        # flight on a single MXU (hides MXU push/pop latency on v5e/v6e).
        gf = xpf_ref[tf].astype(jnp.float32) + jnp.dot(
            hf[...], whf, preferred_element_type=jnp.float32)
        gb = xpb_ref[tb].astype(jnp.float32) + jnp.dot(
            hb[...], whb, preferred_element_type=jnp.float32)
        hfn, cfn = cell(gf, cf[...])
        hbn, cbn = cell(gb, cb[...])
        hf[...] = hfn
        cf[...] = cfn
        hb[...] = hbn
        cb[...] = cbn
        hseqf_ref[tf] = hfn      # lane-dense (Hp % 128 == 0): unmasked stores
        hseqb_ref[tb] = hbn
        return carry

    # Bounded partial unroll: scheduler visibility without vreg blow-up.
    jax.lax.fori_loop(0, ts, step, 0, unroll=min(8, ts))


def lstm_recurrence(xp_f, xp_b, w_hh_f, w_hh_b, *, time_block=None,
                    batch_block=None):
    """Sequential part of one bidirectional LSTM layer.
    xp_f/xp_b: (S, Bp, 4*Hp) bf16 (bias already folded in); w_hh_*: (Hp, 4*Hp) f32.
    Returns hseq_f, hseq_b: (S, Bp, Hp) f32 in natural time order."""
    S, Bp, G = xp_f.shape
    Hp = w_hh_f.shape[0]
    ts = time_block or S
    bb = batch_block or Bp
    assert S % ts == 0 and Bp % bb == 0
    assert bb % SUBLANE == 0 and Hp % LANE == 0 and G == 4 * Hp
    nc = S // ts
    nb = Bp // bb

    return pl.pallas_call(
        _bilstm_chunk_kernel,
        out_shape=(jax.ShapeDtypeStruct((S, Bp, Hp), jnp.float32),
                   jax.ShapeDtypeStruct((S, Bp, Hp), jnp.float32)),
        grid_spec=pltpu.PrefetchScalarGridSpec(
            num_scalar_prefetch=0,
            grid=(nb, nc),                        # (batch shards, time chunks)
            in_specs=[
                # forward xp: chunk c
                pl.BlockSpec((ts, bb, G), lambda b, c: (c, b, 0)),
                # backward xp: chunks visited in reverse order
                pl.BlockSpec((ts, bb, G), lambda b, c: (nc - 1 - c, b, 0)),
                pl.BlockSpec((Hp, G), lambda b, c: (0, 0)),
                pl.BlockSpec((Hp, G), lambda b, c: (0, 0)),
            ],
            out_specs=[
                pl.BlockSpec((ts, bb, Hp), lambda b, c: (c, b, 0)),
                pl.BlockSpec((ts, bb, Hp), lambda b, c: (nc - 1 - c, b, 0)),
            ],
            scratch_shapes=[pltpu.VMEM((bb, Hp), jnp.float32)] * 4,  # hf cf hb cb
        ),
        compiler_params=pltpu.CompilerParams(
            # batch shards independent (v7x: one per TensorCore); time chunks
            # sequential (state carried in scratch).
            dimension_semantics=("parallel", "arbitrary"),
            vmem_limit_bytes=64 * 1024 * 1024,
        ),
    )(xp_f, xp_b, w_hh_f, w_hh_b)


# ----------------------------------------------------------------------------
# Parameters (synthetic, PyTorch nn.LSTM layout) + kernel-layout repacking.
# ----------------------------------------------------------------------------
def init_params(key, vocab_size, E, H, L, n_class):
    keys = iter(jax.random.split(key, 5 + 8 * L))

    def uni(k, shape, scale):
        return jax.random.uniform(k, shape, jnp.float32, -scale, scale)

    s = 1.0 / float(H) ** 0.5
    params = {
        "embed": jax.random.normal(next(keys), (vocab_size, E), jnp.float32) * 0.1,
        "dec_w": uni(next(keys), (2 * H, 64), 1.0 / float(2 * H) ** 0.5),
        "dec_b": uni(next(keys), (64,), 1.0 / float(2 * H) ** 0.5),
        "fc_w": uni(next(keys), (64, n_class), 1.0 / 8.0),
        "fc_b": uni(next(keys), (n_class,), 1.0 / 8.0),
        "lstm": [],
    }
    for layer in range(L):
        d_in = E if layer == 0 else 2 * H
        lp = {}
        for z in ("f", "b"):                       # PyTorch gate order (i, f, g, o)
            lp[f"w_ih_{z}"] = uni(next(keys), (d_in, 4 * H), s)
            lp[f"w_hh_{z}"] = uni(next(keys), (H, 4 * H), s)
            lp[f"b_{z}"] = uni(next(keys), (4 * H,), s) + uni(next(keys), (4 * H,), s)
        params["lstm"].append(lp)
    return params


def _permute_pad_gates(w, H, Hp):
    """Last axis (4H, order i,f,g,o) -> (4*Hp, order i,f,o,g); each gate block
    zero-padded H -> Hp columns so everything downstream is lane-dense."""
    i, f, g, o = (w[..., k * H:(k + 1) * H] for k in range(4))
    pad = [(0, 0)] * (w.ndim - 1) + [(0, Hp - H)]
    return jnp.concatenate([jnp.pad(blk, pad) for blk in (i, f, o, g)], axis=-1)


def _pad_rows(w, rows):
    return jnp.pad(w, ((0, rows - w.shape[0]), (0, 0)))


def pack_lstm_params(params, H):
    """One-time repack: gate permutation, hidden-dim lane padding, and split of
    layer>0 input weights into a fwd half and a bwd half (no inter-layer concat).
    Padded gate/hidden slots stay exactly zero through the recurrence."""
    Hp = _round_up(H, LANE)
    packed = []
    for li, lp in enumerate(params["lstm"]):
        entry = {}
        for z in ("f", "b"):
            w_ih = _permute_pad_gates(lp[f"w_ih_{z}"], H, Hp)        # (d_in, 4*Hp)
            if li == 0:
                entry[f"w_x_{z}"] = (w_ih,)                          # applied to embeddings
            else:
                entry[f"w_x_{z}"] = (_pad_rows(w_ih[:H], Hp),        # applied to fwd hseq
                                     _pad_rows(w_ih[H:], Hp))        # applied to bwd hseq
            entry[f"w_hh_{z}"] = _pad_rows(
                _permute_pad_gates(lp[f"w_hh_{z}"], H, Hp), Hp)      # (Hp, 4*Hp)
            entry[f"b_{z}"] = _permute_pad_gates(lp[f"b_{z}"], H, Hp)  # (4*Hp,)
        packed.append(entry)
    return packed


# ----------------------------------------------------------------------------
# Forward pass (mirrors RNN_LSTM.forward).
# ----------------------------------------------------------------------------
def rnn_lstm_forward(model, tokens, *, time_block=None, batch_block=None):
    B, S = tokens.shape
    H = model["dec_w"].shape[0] // 2
    Bp = _round_up(B, SUBLANE)

    # Embedding gather (XLA) + (B,S,E) -> (S,B,E) + batch pad to full sublanes.
    emb = jnp.take(model["embed"], tokens, axis=0)
    x = jnp.transpose(emb, (1, 0, 2)).astype(jnp.float32)
    x = jnp.pad(x, ((0, 0), (0, Bp - B), (0, 0)))

    hseq_f = hseq_b = None
    for li, kp in enumerate(model["lstm"]):
        # Hoisted input projection: one big MXU matmul per direction covering
        # all timesteps; only h @ W_hh stays inside the sequential kernel.
        if li == 0:
            xp_f = jnp.einsum("sbe,eg->sbg", x, kp["w_x_f"][0],
                              preferred_element_type=jnp.float32) + kp["b_f"]
            xp_b = jnp.einsum("sbe,eg->sbg", x, kp["w_x_b"][0],
                              preferred_element_type=jnp.float32) + kp["b_b"]
        else:
            wff, wfb = kp["w_x_f"]
            wbf, wbb = kp["w_x_b"]
            xp_f = (jnp.einsum("sbh,hg->sbg", hseq_f, wff, preferred_element_type=jnp.float32)
                    + jnp.einsum("sbh,hg->sbg", hseq_b, wfb, preferred_element_type=jnp.float32)
                    + kp["b_f"])
            xp_b = (jnp.einsum("sbh,hg->sbg", hseq_f, wbf, preferred_element_type=jnp.float32)
                    + jnp.einsum("sbh,hg->sbg", hseq_b, wbb, preferred_element_type=jnp.float32)
                    + kp["b_b"])
        # xp is by far the largest buffer -> bf16; accumulation is f32 in-kernel.
        hseq_f, hseq_b = lstm_recurrence(
            xp_f.astype(jnp.bfloat16), xp_b.astype(jnp.bfloat16),
            kp["w_hh_f"], kp["w_hh_b"],
            time_block=time_block, batch_block=batch_block)

    # torch: cat((h_n[-1,0], h_n[-1,1]), -1) == [fwd final @ t=S-1, bwd final @ t=0]
    h_cat = jnp.concatenate([hseq_f[S - 1, :B, :H], hseq_b[0, :B, :H]], axis=-1)

    # Tiny head stays in XLA (a dedicated pallas_call would be pure launch overhead).
    z = h_cat @ model["dec_w"] + model["dec_b"]
    return z @ model["fc_w"] + model["fc_b"]


if __name__ == "__main__":
    VOCAB, E, H, L, N_CLASS = 50, 32, 32, 2, 2
    B, S = 2, 8

    key = jax.random.PRNGKey(0)
    k_param, k_tok = jax.random.split(key)
    raw = init_params(k_param, VOCAB, E, H, L, N_CLASS)
    model = {
        "embed": raw["embed"], "dec_w": raw["dec_w"], "dec_b": raw["dec_b"],
        "fc_w": raw["fc_w"], "fc_b": raw["fc_b"],
        "lstm": pack_lstm_params(raw, H),    # one-time repack (gate permute + lane pad)
    }
    tokens = jax.random.randint(k_tok, (B, S), 0, VOCAB, dtype=jnp.int32)

    # time_block=4 exercises the time-chunked pipeline (2 chunks of 4 steps).
    fwd = jax.jit(functools.partial(rnn_lstm_forward, time_block=4))
    out = fwd(model, tokens)
    jax.block_until_ready(out)
    assert out.shape == (B, N_CLASS) and out.dtype == jnp.float32
    assert bool(jnp.all(jnp.isfinite(out)))
    print("KERNEL_OK")
</pallas_src>

<mosaic_0001>
module attributes {stable_mosaic.version = 11 : i64} {
  func.func @_bilstm_chunk_kernel(%arg0: i32, %arg1: i32, %arg2: memref<4x8x512xbf16, #tpu.memory_space<vmem>>, %arg3: memref<4x8x512xbf16, #tpu.memory_space<vmem>>, %arg4: memref<128x512xf32, #tpu.memory_space<vmem>>, %arg5: memref<128x512xf32, #tpu.memory_space<vmem>>, %arg6: memref<4x8x128xf32, #tpu.memory_space<vmem>>, %arg7: memref<4x8x128xf32, #tpu.memory_space<vmem>>, %arg8: memref<8x128xf32, #tpu.memory_space<vmem>>, %arg9: memref<8x128xf32, #tpu.memory_space<vmem>>, %arg10: memref<8x128xf32, #tpu.memory_space<vmem>>, %arg11: memref<8x128xf32, #tpu.memory_space<vmem>>) attributes {dimension_semantics = [#tpu.dimension_semantics<parallel>, #tpu.dimension_semantics<arbitrary>], iteration_bounds = array<i64: 1, 2>, scalar_prefetch = 0 : i64, scratch_operands = 4 : i64, tpu.core_type = #tpu.core_type<tc>, window_params = [{transform_indices = @transform_0, window_bounds = array<i64: 4, 8, 512>}, {transform_indices = @transform_1, window_bounds = array<i64: 4, 8, 512>}, {pipeline_mode = #tpu.pipeline_mode<synchronous>, transform_indices = @transform_2, window_bounds = array<i64: 128, 512>}, {pipeline_mode = #tpu.pipeline_mode<synchronous>, transform_indices = @transform_3, window_bounds = array<i64: 128, 512>}, {transform_indices = @transform_4, window_bounds = array<i64: 4, 8, 128>}, {transform_indices = @transform_5, window_bounds = array<i64: 4, 8, 128>}]} {
    %c0_i32 = arith.constant 0 : i32
    %0 = arith.cmpi eq, %arg1, %c0_i32 : i32
    %1 = arith.extui %0 : i1 to i32
    %c0_i32_0 = arith.constant 0 : i32
    %2 = arith.cmpi ne, %1, %c0_i32_0 : i32
    scf.if %2 {
      %cst_120 = arith.constant 0.000000e+00 : f32
      %249 = vector.broadcast %cst_120 : f32 to vector<8x128xf32>
      %c0_121 = arith.constant 0 : index
      %c0_122 = arith.constant 0 : index
      %250 = vector.load %arg8[%c0_121, %c0_122] : memref<8x128xf32, #tpu.memory_space<vmem>>, vector<8x128xf32>
      tpu.vector_store %arg8[%c0_121, %c0_122], %249 {strides = array<i32>} : memref<8x128xf32, #tpu.memory_space<vmem>>, vector<8x128xf32>,
      %c0_123 = arith.constant 0 : index
      %c0_124 = arith.constant 0 : index
      %251 = vector.load %arg9[%c0_123, %c0_124] : memref<8x128xf32, #tpu.memory_space<vmem>>, vector<8x128xf32>
      tpu.vector_store %arg9[%c0_123, %c0_124], %249 {strides = array<i32>} : memref<8x128xf32, #tpu.memory_space<vmem>>, vector<8x128xf32>,
      %c0_125 = arith.constant 0 : index
      %c0_126 = arith.constant 0 : index
      %252 = vector.load %arg10[%c0_125, %c0_126] : memref<8x128xf32, #tpu.memory_space<vmem>>, vector<8x128xf32>
      tpu.vector_store %arg10[%c0_125, %c0_126], %249 {strides = array<i32>} : memref<8x128xf32, #tpu.memory_space<vmem>>, vector<8x128xf32>,
      %c0_127 = arith.constant 0 : index
      %c0_128 = arith.constant 0 : index
      %253 = vector.load %arg11[%c0_127, %c0_128] : memref<8x128xf32, #tpu.memory_space<vmem>>, vector<8x128xf32>
      tpu.vector_store %arg11[%c0_127, %c0_128], %249 {strides = array<i32>} : memref<8x128xf32, #tpu.memory_space<vmem>>, vector<8x128xf32>,
    } else {
    }
    %c0 = arith.constant 0 : index
    %c0_1 = arith.constant 0 : index
    %3 = vector.load %arg4[%c0, %c0_1] : memref<128x512xf32, #tpu.memory_space<vmem>>, vector<128x512xf32>
    %c0_2 = arith.constant 0 : index
    %c0_3 = arith.constant 0 : index
    %4 = vector.load %arg5[%c0_2, %c0_3] : memref<128x512xf32, #tpu.memory_space<vmem>>, vector<128x512xf32>
    %c0_i32_4 = arith.constant 0 : i32
    %c3_i32 = arith.constant 3 : i32
    %5 = arith.subi %c3_i32, %c0_i32_4 : i32
    %6 = arith.index_cast %c0_i32_4 : i32 to index
    %c0_5 = arith.constant 0 : index
    %c0_6 = arith.constant 0 : index
    %7 = vector.load %arg2[%6, %c0_5, %c0_6] : memref<4x8x512xbf16, #tpu.memory_space<vmem>>, vector<1x8x512xbf16>
    %8 = vector.shape_cast %7 : vector<1x8x512xbf16> to vector<8x512xbf16>
    %9 = arith.extf %8 : vector<8x512xbf16> to vector<8x512xf32>
    %c0_7 = arith.constant 0 : index
    %c0_8 = arith.constant 0 : index
    %10 = vector.load %arg8[%c0_7, %c0_8] : memref<8x128xf32, #tpu.memory_space<vmem>>, vector<8x128xf32>
    %cst = arith.constant dense<0.000000e+00> : vector<8x512xf32>
    %11 = tpu.matmul %10, %3, %cst {dimension_numbers = #tpu.dot_dimension_numbers<[1], [0], [0], [1], [0, 0, 1, 1], [], []>} : vector<8x128xf32>, vector<128x512xf32>, vector<8x512xf32> -> vector<8x512xf32>
    %12 = arith.addf %9, %11 : vector<8x512xf32>
    %13 = arith.index_cast %5 : i32 to index
    %c0_9 = arith.constant 0 : index
    %c0_10 = arith.constant 0 : index
    %14 = vector.load %arg3[%13, %c0_9, %c0_10] : memref<4x8x512xbf16, #tpu.memory_space<vmem>>, vector<1x8x512xbf16>
    %15 = vector.shape_cast %14 : vector<1x8x512xbf16> to vector<8x512xbf16>
    %16 = arith.extf %15 : vector<8x512xbf16> to vector<8x512xf32>
    %c0_11 = arith.constant 0 : index
    %c0_12 = arith.constant 0 : index
    %17 = vector.load %arg10[%c0_11, %c0_12] : memref<8x128xf32, #tpu.memory_space<vmem>>, vector<8x128xf32>
    %cst_13 = arith.constant dense<0.000000e+00> : vector<8x512xf32>
    %18 = tpu.matmul %17, %4, %cst_13 {dimension_numbers = #tpu.dot_dimension_numbers<[1], [0], [0], [1], [0, 0, 1, 1], [], []>} : vector<8x128xf32>, vector<128x512xf32>, vector<8x512xf32> -> vector<8x512xf32>
    %19 = arith.addf %16, %18 : vector<8x512xf32>
    %c0_14 = arith.constant 0 : index
    %c0_15 = arith.constant 0 : index
    %20 = vector.load %arg9[%c0_14, %c0_15] : memref<8x128xf32, #tpu.memory_space<vmem>>, vector<8x128xf32>
    %21 = vector.extract_strided_slice %12 {offsets = [0, 0], sizes = [8, 384], strides = [1, 1]} : vector<8x512xf32> to vector<8x384xf32>
    %22 = arith.negf %21 : vector<8x384xf32>
    %23 = math.exp %22 : vector<8x384xf32>
    %cst_16 = arith.constant 1.000000e+00 : f32
    %24 = vector.broadcast %cst_16 : f32 to vector<8x384xf32>
    %25 = arith.addf %24, %23 : vector<8x384xf32>
    %26 = arith.divf %24, %25 : vector<8x384xf32>
    %27 = vector.extract_strided_slice %12 {offsets = [0, 384], sizes = [8, 128], strides = [1, 1]} : vector<8x512xf32> to vector<8x128xf32>
    %28 = math.tanh %27 : vector<8x128xf32>
    %29 = vector.extract_strided_slice %26 {offsets = [0, 0], sizes = [8, 128], strides = [1, 1]} : vector<8x384xf32> to vector<8x128xf32>
    %30 = vector.extract_strided_slice %26 {offsets = [0, 128], sizes = [8, 128], strides = [1, 1]} : vector<8x384xf32> to vector<8x128xf32>
    %31 = vector.extract_strided_slice %26 {offsets = [0, 256], sizes = [8, 128], strides = [1, 1]} : vector<8x384xf32> to vector<8x128xf32>
    %32 = arith.mulf %30, %20 : vector<8x128xf32>
    %33 = arith.mulf %29, %28 : vector<8x128xf32>
    %34 = arith.addf %32, %33 : vector<8x128xf32>
    %35 = math.tanh %34 : vector<8x128xf32>
    %36 = arith.mulf %31, %35 : vector<8x128xf32>
    %c0_17 = arith.constant 0 : index
    %c0_18 = arith.constant 0 : index
    %37 = vector.load %arg11[%c0_17, %c0_18] : memref<8x128xf32, #tpu.memory_space<vmem>>, vector<8x128xf32>
    %38 = vector.extract_strided_slice %19 {offsets = [0, 0], sizes = [8, 384], strides = [1, 1]} : vector<8x512xf32> to vector<8x384xf32>
    %39 = arith.negf %38 : vector<8x384xf32>
    %40 = math.exp %39 : vector<8x384xf32>
    %cst_19 = arith.constant 1.000000e+00 : f32
    %41 = vector.broadcast %cst_19 : f32 to vector<8x384xf32>
    %42 = arith.addf %41, %40 : vector<8x384xf32>
    %43 = arith.divf %41, %42 : vector<8x384xf32>
    %44 = vector.extract_strided_slice %19 {offsets = [0, 384], sizes = [8, 128], strides = [1, 1]} : vector<8x512xf32> to vector<8x128xf32>
    %45 = math.tanh %44 : vector<8x128xf32>
    %46 = vector.extract_strided_slice %43 {offsets = [0, 0], sizes = [8, 128], strides = [1, 1]} : vector<8x384xf32> to vector<8x128xf32>
    %47 = vector.extract_strided_slice %43 {offsets = [0, 128], sizes = [8, 128], strides = [1, 1]} : vector<8x384xf32> to vector<8x128xf32>
    %48 = vector.extract_strided_slice %43 {offsets = [0, 256], sizes = [8, 128], strides = [1, 1]} : vector<8x384xf32> to vector<8x128xf32>
    %49 = arith.mulf %47, %37 : vector<8x128xf32>
    %50 = arith.mulf %46, %45 : vector<8x128xf32>
    %51 = arith.addf %49, %50 : vector<8x128xf32>
    %52 = math.tanh %51 : vector<8x128xf32>
    %53 = arith.mulf %48, %52 : vector<8x128xf32>
    %c0_20 = arith.constant 0 : index
    %c0_21 = arith.constant 0 : index
    %54 = vector.load %arg8[%c0_20, %c0_21] : memref<8x128xf32, #tpu.memory_space<vmem>>, vector<8x128xf32>
    tpu.vector_store %arg8[%c0_20, %c0_21], %36 {strides = array<i32>} : memref<8x128xf32, #tpu.memory_space<vmem>>, vector<8x128xf32>,
    %c0_22 = arith.constant 0 : index
    %c0_23 = arith.constant 0 : index
    %55 = vector.load %arg9[%c0_22, %c0_23] : memref<8x128xf32, #tpu.memory_space<vmem>>, vector<8x128xf32>
    tpu.vector_store %arg9[%c0_22, %c0_23], %34 {strides = array<i32>} : memref<8x128xf32, #tpu.memory_space<vmem>>, vector<8x128xf32>,
    %c0_24 = arith.constant 0 : index
    %c0_25 = arith.constant 0 : index
    %56 = vector.load %arg10[%c0_24, %c0_25] : memref<8x128xf32, #tpu.memory_space<vmem>>, vector<8x128xf32>
    tpu.vector_store %arg10[%c0_24, %c0_25], %53 {strides = array<i32>} : memref<8x128xf32, #tpu.memory_space<vmem>>, vector<8x128xf32>,
    %c0_26 = arith.constant 0 : index
    %c0_27 = arith.constant 0 : index
    %57 = vector.load %arg11[%c0_26, %c0_27] : memref<8x128xf32, #tpu.memory_space<vmem>>, vector<8x128xf32>
    tpu.vector_store %arg11[%c0_26, %c0_27], %51 {strides = array<i32>} : memref<8x128xf32, #tpu.memory_space<vmem>>, vector<8x128xf32>,
    %58 = arith.index_cast %c0_i32_4 : i32 to index
    %c0_28 = arith.constant 0 : index
    %c0_29 = arith.constant 0 : index
    %59 = vector.load %arg6[%58, %c0_28, %c0_29] : memref<4x8x128xf32, #tpu.memory_space<vmem>>, vector<1x8x128xf32>
    %60 = vector.shape_cast %59 : vector<1x8x128xf32> to vector<8x128xf32>
    %61 = vector.shape_cast %36 : vector<8x128xf32> to vector<1x8x128xf32>
    tpu.vector_store %arg6[%58, %c0_28, %c0_29], %61 {strides = array<i32>} : memref<4x8x128xf32, #tpu.memory_space<vmem>>, vector<1x8x128xf32>,
    %62 = arith.index_cast %5 : i32 to index
    %c0_30 = arith.constant 0 : index
    %c0_31 = arith.constant 0 : index
    %63 = vector.load %arg7[%62, %c0_30, %c0_31] : memref<4x8x128xf32, #tpu.memory_space<vmem>>, vector<1x8x128xf32>
    %64 = vector.shape_cast %63 : vector<1x8x128xf32> to vector<8x128xf32>
    %65 = vector.shape_cast %53 : vector<8x128xf32> to vector<1x8x128xf32>
    tpu.vector_store %arg7[%62, %c0_30, %c0_31], %65 {strides = array<i32>} : memref<4x8x128xf32, #tpu.memory_space<vmem>>, vector<1x8x128xf32>,
    %c1_i32 = arith.constant 1 : i32
    %c3_i32_32 = arith.constant 3 : i32
    %66 = arith.subi %c3_i32_32, %c1_i32 : i32
    %67 = arith.index_cast %c1_i32 : i32 to index
    %c0_33 = arith.constant 0 : index
    %c0_34 = arith.constant 0 : index
    %68 = vector.load %arg2[%67, %c0_33, %c0_34] : memref<4x8x512xbf16, #tpu.memory_space<vmem>>, vector<1x8x512xbf16>
    %69 = vector.shape_cast %68 : vector<1x8x512xbf16> to vector<8x512xbf16>
    %70 = arith.extf %69 : vector<8x512xbf16> to vector<8x512xf32>
    %c0_35 = arith.constant 0 : index
    %c0_36 = arith.constant 0 : index
    %71 = vector.load %arg8[%c0_35, %c0_36] : memref<8x128xf32, #tpu.memory_space<vmem>>, vector<8x128xf32>
    %cst_37 = arith.constant dense<0.000000e+00> : vector<8x512xf32>
    %72 = tpu.matmul %71, %3, %cst_37 {dimension_numbers = #tpu.dot_dimension_numbers<[1], [0], [0], [1], [0, 0, 1, 1], [], []>} : vector<8x128xf32>, vector<128x512xf32>, vector<8x512xf32> -> vector<8x512xf32>
    %73 = arith.addf %70, %72 : vector<8x512xf32>
    %74 = arith.index_cast %66 : i32 to index
    %c0_38 = arith.constant 0 : index
    %c0_39 = arith.constant 0 : index
    %75 = vector.load %arg3[%74, %c0_38, %c0_39] : memref<4x8x512xbf16, #tpu.memory_space<vmem>>, vector<1x8x512xbf16>
    %76 = vector.shape_cast %75 : vector<1x8x512xbf16> to vector<8x512xbf16>
    %77 = arith.extf %76 : vector<8x512xbf16> to vector<8x512xf32>
    %c0_40 = arith.constant 0 : index
    %c0_41 = arith.constant 0 : index
    %78 = vector.load %arg10[%c0_40, %c0_41] : memref<8x128xf32, #tpu.memory_space<vmem>>, vector<8x128xf32>
    %cst_42 = arith.constant dense<0.000000e+00> : vector<8x512xf32>
    %79 = tpu.matmul %78, %4, %cst_42 {dimension_numbers = #tpu.dot_dimension_numbers<[1], [0], [0], [1], [0, 0, 1, 1], [], []>} : vector<8x128xf32>, vector<128x512xf32>, vector<8x512xf32> -> vector<8x512xf32>
    %80 = arith.addf %77, %79 : vector<8x512xf32>
    %c0_43 = arith.constant 0 : index
    %c0_44 = arith.constant 0 : index
    %81 = vector.load %arg9[%c0_43, %c0_44] : memref<8x128xf32, #tpu.memory_space<vmem>>, vector<8x128xf32>
    %82 = vector.extract_strided_slice %73 {offsets = [0, 0], sizes = [8, 384], strides = [1, 1]} : vector<8x512xf32> to vector<8x384xf32>
    %83 = arith.negf %82 : vector<8x384xf32>
    %84 = math.exp %83 : vector<8x384xf32>
    %cst_45 = arith.constant 1.000000e+00 : f32
    %85 = vector.broadcast %cst_45 : f32 to vector<8x384xf32>
    %86 = arith.addf %85, %84 : vector<8x384xf32>
    %87 = arith.divf %85, %86 : vector<8x384xf32>
    %88 = vector.extract_strided_slice %73 {offsets = [0, 384], sizes = [8, 128], strides = [1, 1]} : vector<8x512xf32> to vector<8x128xf32>
    %89 = math.tanh %88 : vector<8x128xf32>
    %90 = vector.extract_strided_slice %87 {offsets = [0, 0], sizes = [8, 128], strides = [1, 1]} : vector<8x384xf32> to vector<8x128xf32>
    %91 = vector.extract_strided_slice %87 {offsets = [0, 128], sizes = [8, 128], strides = [1, 1]} : vector<8x384xf32> to vector<8x128xf32>
    %92 = vector.extract_strided_slice %87 {offsets = [0, 256], sizes = [8, 128], strides = [1, 1]} : vector<8x384xf32> to vector<8x128xf32>
    %93 = arith.mulf %91, %81 : vector<8x128xf32>
    %94 = arith.mulf %90, %89 : vector<8x128xf32>
    %95 = arith.addf %93, %94 : vector<8x128xf32>
    %96 = math.tanh %95 : vector<8x128xf32>
    %97 = arith.mulf %92, %96 : vector<8x128xf32>
    %c0_46 = arith.constant 0 : index
    %c0_47 = arith.constant 0 : index
    %98 = vector.load %arg11[%c0_46, %c0_47] : memref<8x128xf32, #tpu.memory_space<vmem>>, vector<8x128xf32>
    %99 = vector.extract_strided_slice %80 {offsets = [0, 0], sizes = [8, 384], strides = [1, 1]} : vector<8x512xf32> to vector<8x384xf32>
    %100 = arith.negf %99 : vector<8x384xf32>
    %101 = math.exp %100 : vector<8x384xf32>
    %cst_48 = arith.constant 1.000000e+00 : f32
    %102 = vector.broadcast %cst_48 : f32 to vector<8x384xf32>
    %103 = arith.addf %102, %101 : vector<8x384xf32>
    %104 = arith.divf %102, %103 : vector<8x384xf32>
    %105 = vector.extract_strided_slice %80 {offsets = [0, 384], sizes = [8, 128], strides = [1, 1]} : vector<8x512xf32> to vector<8x128xf32>
    %106 = math.tanh %105 : vector<8x128xf32>
    %107 = vector.extract_strided_slice %104 {offsets = [0, 0], sizes = [8, 128], strides = [1, 1]} : vector<8x384xf32> to vector<8x128xf32>
    %108 = vector.extract_strided_slice %104 {offsets = [0, 128], sizes = [8, 128], strides = [1, 1]} : vector<8x384xf32> to vector<8x128xf32>
    %109 = vector.extract_strided_slice %104 {offsets = [0, 256], sizes = [8, 128], strides = [1, 1]} : vector<8x384xf32> to vector<8x128xf32>
    %110 = arith.mulf %108, %98 : vector<8x128xf32>
    %111 = arith.mulf %107, %106 : vector<8x128xf32>
    %112 = arith.addf %110, %111 : vector<8x128xf32>
    %113 = math.tanh %112 : vector<8x128xf32>
    %114 = arith.mulf %109, %113 : vector<8x128xf32>
    %c0_49 = arith.constant 0 : index
    %c0_50 = arith.constant 0 : index
    %115 = vector.load %arg8[%c0_49, %c0_50] : memref<8x128xf32, #tpu.memory_space<vmem>>, vector<8x128xf32>
    tpu.vector_store %arg8[%c0_49, %c0_50], %97 {strides = array<i32>} : memref<8x128xf32, #tpu.memory_space<vmem>>, vector<8x128xf32>,
    %c0_51 = arith.constant 0 : index
    %c0_52 = arith.constant 0 : index
    %116 = vector.load %arg9[%c0_51, %c0_52] : memref<8x128xf32, #tpu.memory_space<vmem>>, vector<8x128xf32>
    tpu.vector_store %arg9[%c0_51, %c0_52], %95 {strides = array<i32>} : memref<8x128xf32, #tpu.memory_space<vmem>>, vector<8x128xf32>,
    %c0_53 = arith.constant 0 : index
    %c0_54 = arith.constant 0 : index
    %117 = vector.load %arg10[%c0_53, %c0_54] : memref<8x128xf32, #tpu.memory_space<vmem>>, vector<8x128xf32>
    tpu.vector_store %arg10[%c0_53, %c0_54], %114 {strides = array<i32>} : memref<8x128xf32, #tpu.memory_space<vmem>>, vector<8x128xf32>,
    %c0_55 = arith.constant 0 : index
    %c0_56 = arith.constant 0 : index
    %118 = vector.load %arg11[%c0_55, %c0_56] : memref<8x128xf32, #tpu.memory_space<vmem>>, vector<8x128xf32>
    tpu.vector_store %arg11[%c0_55, %c0_56], %112 {strides = array<i32>} : memref<8x128xf32, #tpu.memory_space<vmem>>, vector<8x128xf32>,
    %119 = arith.index_cast %c1_i32 : i32 to index
    %c0_57 = arith.constant 0 : index
    %c0_58 = arith.constant 0 : index
    %120 = vector.load %arg6[%119, %c0_57, %c0_58] : memref<4x8x128xf32, #tpu.memory_space<vmem>>, vector<1x8x128xf32>
    %121 = vector.shape_cast %120 : vector<1x8x128xf32> to vector<8x128xf32>
    %122 = vector.shape_cast %97 : vector<8x128xf32> to vector<1x8x128xf32>
    tpu.vector_store %arg6[%119, %c0_57, %c0_58], %122 {strides = array<i32>} : memref<4x8x128xf32, #tpu.memory_space<vmem>>, vector<1x8x128xf32>,
    %123 = arith.index_cast %66 : i32 to index
    %c0_59 = arith.constant 0 : index
    %c0_60 = arith.constant 0 : index
    %124 = vector.load %arg7[%123, %c0_59, %c0_60] : memref<4x8x128xf32, #tpu.memory_space<vmem>>, vector<1x8x128xf32>
    %125 = vector.shape_cast %124 : vector<1x8x128xf32> to vector<8x128xf32>
    %126 = vector.shape_cast %114 : vector<8x128xf32> to vector<1x8x128xf32>
    tpu.vector_store %arg7[%123, %c0_59, %c0_60], %126 {strides = array<i32>} : memref<4x8x128xf32, #tpu.memory_space<vmem>>, vector<1x8x128xf32>,
    %c2_i32 = arith.constant 2 : i32
    %c3_i32_61 = arith.constant 3 : i32
    %127 = arith.subi %c3_i32_61, %c2_i32 : i32
    %128 = arith.index_cast %c2_i32 : i32 to index
    %c0_62 = arith.constant 0 : index
    %c0_63 = arith.constant 0 : index
    %129 = vector.load %arg2[%128, %c0_62, %c0_63] : memref<4x8x512xbf16, #tpu.memory_space<vmem>>, vector<1x8x512xbf16>
    %130 = vector.shape_cast %129 : vector<1x8x512xbf16> to vector<8x512xbf16>
    %131 = arith.extf %130 : vector<8x512xbf16> to vector<8x512xf32>
    %c0_64 = arith.constant 0 : index
    %c0_65 = arith.constant 0 : index
    %132 = vector.load %arg8[%c0_64, %c0_65] : memref<8x128xf32, #tpu.memory_space<vmem>>, vector<8x128xf32>
    %cst_66 = arith.constant dense<0.000000e+00> : vector<8x512xf32>
    %133 = tpu.matmul %132, %3, %cst_66 {dimension_numbers = #tpu.dot_dimension_numbers<[1], [0], [0], [1], [0, 0, 1, 1], [], []>} : vector<8x128xf32>, vector<128x512xf32>, vector<8x512xf32> -> vector<8x512xf32>
    %134 = arith.addf %131, %133 : vector<8x512xf32>
    %135 = arith.index_cast %127 : i32 to index
    %c0_67 = arith.constant 0 : index
    %c0_68 = arith.constant 0 : index
    %136 = vector.load %arg3[%135, %c0_67, %c0_68] : memref<4x8x512xbf16, #tpu.memory_space<vmem>>, vector<1x8x512xbf16>
    %137 = vector.shape_cast %136 : vector<1x8x512xbf16> to vector<8x512xbf16>
    %138 = arith.extf %137 : vector<8x512xbf16> to vector<8x512xf32>
    %c0_69 = arith.constant 0 : index
    %c0_70 = arith.constant 0 : index
    %139 = vector.load %arg10[%c0_69, %c0_70] : memref<8x128xf32, #tpu.memory_space<vmem>>, vector<8x128xf32>
    %cst_71 = arith.constant dense<0.000000e+00> : vector<8x512xf32>
    %140 = tpu.matmul %139, %4, %cst_71 {dimension_numbers = #tpu.dot_dimension_numbers<[1], [0], [0], [1], [0, 0, 1, 1], [], []>} : vector<8x128xf32>, vector<128x512xf32>, vector<8x512xf32> -> vector<8x512xf32>
    %141 = arith.addf %138, %140 : vector<8x512xf32>
    %c0_72 = arith.constant 0 : index
    %c0_73 = arith.constant 0 : index
    %142 = vector.load %arg9[%c0_72, %c0_73] : memref<8x128xf32, #tpu.memory_space<vmem>>, vector<8x128xf32>
    %143 = vector.extract_strided_slice %134 {offsets = [0, 0], sizes = [8, 384], strides = [1, 1]} : vector<8x512xf32> to vector<8x384xf32>
    %144 = arith.negf %143 : vector<8x384xf32>
    %145 = math.exp %144 : vector<8x384xf32>
    %cst_74 = arith.constant 1.000000e+00 : f32
    %146 = vector.broadcast %cst_74 : f32 to vector<8x384xf32>
    %147 = arith.addf %146, %145 : vector<8x384xf32>
    %148 = arith.divf %146, %147 : vector<8x384xf32>
    %149 = vector.extract_strided_slice %134 {offsets = [0, 384], sizes = [8, 128], strides = [1, 1]} : vector<8x512xf32> to vector<8x128xf32>
    %150 = math.tanh %149 : vector<8x128xf32>
    %151 = vector.extract_strided_slice %148 {offsets = [0, 0], sizes = [8, 128], strides = [1, 1]} : vector<8x384xf32> to vector<8x128xf32>
    %152 = vector.extract_strided_slice %148 {offsets = [0, 128], sizes = [8, 128], strides = [1, 1]} : vector<8x384xf32> to vector<8x128xf32>
    %153 = vector.extract_strided_slice %148 {offsets = [0, 256], sizes = [8, 128], strides = [1, 1]} : vector<8x384xf32> to vector<8x128xf32>
    %154 = arith.mulf %152, %142 : vector<8x128xf32>
    %155 = arith.mulf %151, %150 : vector<8x128xf32>
    %156 = arith.addf %154, %155 : vector<8x128xf32>
    %157 = math.tanh %156 : vector<8x128xf32>
    %158 = arith.mulf %153, %157 : vector<8x128xf32>
    %c0_75 = arith.constant 0 : index
    %c0_76 = arith.constant 0 : index
    %159 = vector.load %arg11[%c0_75, %c0_76] : memref<8x128xf32, #tpu.memory_space<vmem>>, vector<8x128xf32>
    %160 = vector.extract_strided_slice %141 {offsets = [0, 0], sizes = [8, 384], strides = [1, 1]} : vector<8x512xf32> to vector<8x384xf32>
    %161 = arith.negf %160 : vector<8x384xf32>
    %162 = math.exp %161 : vector<8x384xf32>
    %cst_77 = arith.constant 1.000000e+00 : f32
    %163 = vector.broadcast %cst_77 : f32 to vector<8x384xf32>
    %164 = arith.addf %163, %162 : vector<8x384xf32>
    %165 = arith.divf %163, %164 : vector<8x384xf32>
    %166 = vector.extract_strided_slice %141 {offsets = [0, 384], sizes = [8, 128], strides = [1, 1]} : vector<8x512xf32> to vector<8x128xf32>
    %167 = math.tanh %166 : vector<8x128xf32>
    %168 = vector.extract_strided_slice %165 {offsets = [0, 0], sizes = [8, 128], strides = [1, 1]} : vector<8x384xf32> to vector<8x128xf32>
    %169 = vector.extract_strided_slice %165 {offsets = [0, 128], sizes = [8, 128], strides = [1, 1]} : vector<8x384xf32> to vector<8x128xf32>
    %170 = vector.extract_strided_slice %165 {offsets = [0, 256], sizes = [8, 128], strides = [1, 1]} : vector<8x384xf32> to vector<8x128xf32>
    %171 = arith.mulf %169, %159 : vector<8x128xf32>
    %172 = arith.mulf %168, %167 : vector<8x128xf32>
    %173 = arith.addf %171, %172 : vector<8x128xf32>
    %174 = math.tanh %173 : vector<8x128xf32>
    %175 = arith.mulf %170, %174 : vector<8x128xf32>
    %c0_78 = arith.constant 0 : index
    %c0_79 = arith.constant 0 : index
    %176 = vector.load %arg8[%c0_78, %c0_79] : memref<8x128xf32, #tpu.memory_space<vmem>>, vector<8x128xf32>
    tpu.vector_store %arg8[%c0_78, %c0_79], %158 {strides = array<i32>} : memref<8x128xf32, #tpu.memory_space<vmem>>, vector<8x128xf32>,
    %c0_80 = arith.constant 0 : index
    %c0_81 = arith.constant 0 : index
    %177 = vector.load %arg9[%c0_80, %c0_81] : memref<8x128xf32, #tpu.memory_space<vmem>>, vector<8x128xf32>
    tpu.vector_store %arg9[%c0_80, %c0_81], %156 {strides = array<i32>} : memref<8x128xf32, #tpu.memory_space<vmem>>, vector<8x128xf32>,
    %c0_82 = arith.constant 0 : index
    %c0_83 = arith.constant 0 : index
    %178 = vector.load %arg10[%c0_82, %c0_83] : memref<8x128xf32, #tpu.memory_space<vmem>>, vector<8x128xf32>
    tpu.vector_store %arg10[%c0_82, %c0_83], %175 {strides = array<i32>} : memref<8x128xf32, #tpu.memory_space<vmem>>, vector<8x128xf32>,
    %c0_84 = arith.constant 0 : index
    %c0_85 = arith.constant 0 : index
    %179 = vector.load %arg11[%c0_84, %c0_85] : memref<8x128xf32, #tpu.memory_space<vmem>>, vector<8x128xf32>
    tpu.vector_store %arg11[%c0_84, %c0_85], %173 {strides = array<i32>} : memref<8x128xf32, #tpu.memory_space<vmem>>, vector<8x128xf32>,
    %180 = arith.index_cast %c2_i32 : i32 to index
    %c0_86 = arith.constant 0 : index
    %c0_87 = arith.constant 0 : index
    %181 = vector.load %arg6[%180, %c0_86, %c0_87] : memref<4x8x128xf32, #tpu.memory_space<vmem>>, vector<1x8x128xf32>
    %182 = vector.shape_cast %181 : vector<1x8x128xf32> to vector<8x128xf32>
    %183 = vector.shape_cast %158 : vector<8x128xf32> to vector<1x8x128xf32>
    tpu.vector_store %arg6[%180, %c0_86, %c0_87], %183 {strides = array<i32>} : memref<4x8x128xf32, #tpu.memory_space<vmem>>, vector<1x8x128xf32>,
    %184 = arith.index_cast %127 : i32 to index
    %c0_88 = arith.constant 0 : index
    %c0_89 = arith.constant 0 : index
    %185 = vector.load %arg7[%184, %c0_88, %c0_89] : memref<4x8x128xf32, #tpu.memory_space<vmem>>, vector<1x8x128xf32>
    %186 = vector.shape_cast %185 : vector<1x8x128xf32> to vector<8x128xf32>
    %187 = vector.shape_cast %175 : vector<8x128xf32> to vector<1x8x128xf32>
    tpu.vector_store %arg7[%184, %c0_88, %c0_89], %187 {strides = array<i32>} : memref<4x8x128xf32, #tpu.memory_space<vmem>>, vector<1x8x128xf32>,
    %c3_i32_90 = arith.constant 3 : i32
    %c3_i32_91 = arith.constant 3 : i32
    %188 = arith.subi %c3_i32_91, %c3_i32_90 : i32
    %189 = arith.index_cast %c3_i32_90 : i32 to index
    %c0_92 = arith.constant 0 : index
    %c0_93 = arith.constant 0 : index
    %190 = vector.load %arg2[%189, %c0_92, %c0_93] : memref<4x8x512xbf16, #tpu.memory_space<vmem>>, vector<1x8x512xbf16>
    %191 = vector.shape_cast %190 : vector<1x8x512xbf16> to vector<8x512xbf16>
    %192 = arith.extf %191 : vector<8x512xbf16> to vector<8x512xf32>
    %c0_94 = arith.constant 0 : index
    %c0_95 = arith.constant 0 : index
    %193 = vector.load %arg8[%c0_94, %c0_95] : memref<8x128xf32, #tpu.memory_space<vmem>>, vector<8x128xf32>
    %cst_96 = arith.constant dense<0.000000e+00> : vector<8x512xf32>
    %194 = tpu.matmul %193, %3, %cst_96 {dimension_numbers = #tpu.dot_dimension_numbers<[1], [0], [0], [1], [0, 0, 1, 1], [], []>} : vector<8x128xf32>, vector<128x512xf32>, vector<8x512xf32> -> vector<8x512xf32>
    %195 = arith.addf %192, %194 : vector<8x512xf32>
    %196 = arith.index_cast %188 : i32 to index
    %c0_97 = arith.constant 0 : index
    %c0_98 = arith.constant 0 : index
    %197 = vector.load %arg3[%196, %c0_97, %c0_98] : memref<4x8x512xbf16, #tpu.memory_space<vmem>>, vector<1x8x512xbf16>
    %198 = vector.shape_cast %197 : vector<1x8x512xbf16> to vector<8x512xbf16>
    %199 = arith.extf %198 : vector<8x512xbf16> to vector<8x512xf32>
    %c0_99 = arith.constant 0 : index
    %c0_100 = arith.constant 0 : index
    %200 = vector.load %arg10[%c0_99, %c0_100] : memref<8x128xf32, #tpu.memory_space<vmem>>, vector<8x128xf32>
    %cst_101 = arith.constant dense<0.000000e+00> : vector<8x512xf32>
    %201 = tpu.matmul %200, %4, %cst_101 {dimension_numbers = #tpu.dot_dimension_numbers<[1], [0], [0], [1], [0, 0, 1, 1], [], []>} : vector<8x128xf32>, vector<128x512xf32>, vector<8x512xf32> -> vector<8x512xf32>
    %202 = arith.addf %199, %201 : vector<8x512xf32>
    %c0_102 = arith.constant 0 : index
    %c0_103 = arith.constant 0 : index
    %203 = vector.load %arg9[%c0_102, %c0_103] : memref<8x128xf32, #tpu.memory_space<vmem>>, vector<8x128xf32>
    %204 = vector.extract_strided_slice %195 {offsets = [0, 0], sizes = [8, 384], strides = [1, 1]} : vector<8x512xf32> to vector<8x384xf32>
    %205 = arith.negf %204 : vector<8x384xf32>
    %206 = math.exp %205 : vector<8x384xf32>
    %cst_104 = arith.constant 1.000000e+00 : f32
    %207 = vector.broadcast %cst_104 : f32 to vector<8x384xf32>
    %208 = arith.addf %207, %206 : vector<8x384xf32>
    %209 = arith.divf %207, %208 : vector<8x384xf32>
    %210 = vector.extract_strided_slice %195 {offsets = [0, 384], sizes = [8, 128], strides = [1, 1]} : vector<8x512xf32> to vector<8x128xf32>
    %211 = math.tanh %210 : vector<8x128xf32>
    %212 = vector.extract_strided_slice %209 {offsets = [0, 0], sizes = [8, 128], strides = [1, 1]} : vector<8x384xf32> to vector<8x128xf32>
    %213 = vector.extract_strided_slice %209 {offsets = [0, 128], sizes = [8, 128], strides = [1, 1]} : vector<8x384xf32> to vector<8x128xf32>
    %214 = vector.extract_strided_slice %209 {offsets = [0, 256], sizes = [8, 128], strides = [1, 1]} : vector<8x384xf32> to vector<8x128xf32>
    %215 = arith.mulf %213, %203 : vector<8x128xf32>
    %216 = arith.mulf %212, %211 : vector<8x128xf32>
    %217 = arith.addf %215, %216 : vector<8x128xf32>
    %218 = math.tanh %217 : vector<8x128xf32>
    %219 = arith.mulf %214, %218 : vector<8x128xf32>
    %c0_105 = arith.constant 0 : index
    %c0_106 = arith.constant 0 : index
    %220 = vector.load %arg11[%c0_105, %c0_106] : memref<8x128xf32, #tpu.memory_space<vmem>>, vector<8x128xf32>
    %221 = vector.extract_strided_slice %202 {offsets = [0, 0], sizes = [8, 384], strides = [1, 1]} : vector<8x512xf32> to vector<8x384xf32>
    %222 = arith.negf %221 : vector<8x384xf32>
    %223 = math.exp %222 : vector<8x384xf32>
    %cst_107 = arith.constant 1.000000e+00 : f32
    %224 = vector.broadcast %cst_107 : f32 to vector<8x384xf32>
    %225 = arith.addf %224, %223 : vector<8x384xf32>
    %226 = arith.divf %224, %225 : vector<8x384xf32>
    %227 = vector.extract_strided_slice %202 {offsets = [0, 384], sizes = [8, 128], strides = [1, 1]} : vector<8x512xf32> to vector<8x128xf32>
    %228 = math.tanh %227 : vector<8x128xf32>
    %229 = vector.extract_strided_slice %226 {offsets = [0, 0], sizes = [8, 128], strides = [1, 1]} : vector<8x384xf32> to vector<8x128xf32>
    %230 = vector.extract_strided_slice %226 {offsets = [0, 128], sizes = [8, 128], strides = [1, 1]} : vector<8x384xf32> to vector<8x128xf32>
    %231 = vector.extract_strided_slice %226 {offsets = [0, 256], sizes = [8, 128], strides = [1, 1]} : vector<8x384xf32> to vector<8x128xf32>
    %232 = arith.mulf %230, %220 : vector<8x128xf32>
    %233 = arith.mulf %229, %228 : vector<8x128xf32>
    %234 = arith.addf %232, %233 : vector<8x128xf32>
    %235 = math.tanh %234 : vector<8x128xf32>
    %236 = arith.mulf %231, %235 : vector<8x128xf32>
    %c0_108 = arith.constant 0 : index
    %c0_109 = arith.constant 0 : index
    %237 = vector.load %arg8[%c0_108, %c0_109] : memref<8x128xf32, #tpu.memory_space<vmem>>, vector<8x128xf32>
    tpu.vector_store %arg8[%c0_108, %c0_109], %219 {strides = array<i32>} : memref<8x128xf32, #tpu.memory_space<vmem>>, vector<8x128xf32>,
    %c0_110 = arith.constant 0 : index
    %c0_111 = arith.constant 0 : index
    %238 = vector.load %arg9[%c0_110, %c0_111] : memref<8x128xf32, #tpu.memory_space<vmem>>, vector<8x128xf32>
    tpu.vector_store %arg9[%c0_110, %c0_111], %217 {strides = array<i32>} : memref<8x128xf32, #tpu.memory_space<vmem>>, vector<8x128xf32>,
    %c0_112 = arith.constant 0 : index
    %c0_113 = arith.constant 0 : index
    %239 = vector.load %arg10[%c0_112, %c0_113] : memref<8x128xf32, #tpu.memory_space<vmem>>, vector<8x128xf32>
    tpu.vector_store %arg10[%c0_112, %c0_113], %236 {strides = array<i32>} : memref<8x128xf32, #tpu.memory_space<vmem>>, vector<8x128xf32>,
    %c0_114 = arith.constant 0 : index
    %c0_115 = arith.constant 0 : index
    %240 = vector.load %arg11[%c0_114, %c0_115] : memref<8x128xf32, #tpu.memory_space<vmem>>, vector<8x128xf32>
    tpu.vector_store %arg11[%c0_114, %c0_115], %234 {strides = array<i32>} : memref<8x128xf32, #tpu.memory_space<vmem>>, vector<8x128xf32>,
    %241 = arith.index_cast %c3_i32_90 : i32 to index
    %c0_116 = arith.constant 0 : index
    %c0_117 = arith.constant 0 : index
    %242 = vector.load %arg6[%241, %c0_116, %c0_117] : memref<4x8x128xf32, #tpu.memory_space<vmem>>, vector<1x8x128xf32>
    %243 = vector.shape_cast %242 : vector<1x8x128xf32> to vector<8x128xf32>
    %244 = vector.shape_cast %219 : vector<8x128xf32> to vector<1x8x128xf32>
    tpu.vector_store %arg6[%241, %c0_116, %c0_117], %244 {strides = array<i32>} : memref<4x8x128xf32, #tpu.memory_space<vmem>>, vector<1x8x128xf32>,
    %245 = arith.index_cast %188 : i32 to index
    %c0_118 = arith.constant 0 : index
    %c0_119 = arith.constant 0 : index
    %246 = vector.load %arg7[%245, %c0_118, %c0_119] : memref<4x8x128xf32, #tpu.memory_space<vmem>>, vector<1x8x128xf32>
    %247 = vector.shape_cast %246 : vector<1x8x128xf32> to vector<8x128xf32>
    %248 = vector.shape_cast %236 : vector<8x128xf32> to vector<1x8x128xf32>
    tpu.vector_store %arg7[%245, %c0_118, %c0_119], %248 {strides = array<i32>} : memref<4x8x128xf32, #tpu.memory_space<vmem>>, vector<1x8x128xf32>,
    %c4_i32 = arith.constant 4 : i32
    return
  }
  func.func @transform_0(%arg0: i32, %arg1: i32) -> (i32, i32, i32) {
    %c0_i32 = arith.constant 0 : i32
    %c0_i32_0 = arith.constant 0 : i32
    return %arg1, %arg0, %c0_i32 : i32, i32, i32
  }
  func.func @transform_1(%arg0: i32, %arg1: i32) -> (i32, i32, i32) {
    %c1_i32 = arith.constant 1 : i32
    %0 = arith.subi %c1_i32, %arg1 : i32
    %c0_i32 = arith.constant 0 : i32
    %c0_i32_0 = arith.constant 0 : i32
    return %0, %arg0, %c0_i32 : i32, i32, i32
  }
  func.func @transform_2(%arg0: i32, %arg1: i32) -> (i32, i32) {
    %c0_i32 = arith.constant 0 : i32
    %c0_i32_0 = arith.constant 0 : i32
    %c0_i32_1 = arith.constant 0 : i32
    return %c0_i32, %c0_i32_0 : i32, i32
  }
  func.func @transform_3(%arg0: i32, %arg1: i32) -> (i32, i32) {
    %c0_i32 = arith.constant 0 : i32
    %c0_i32_0 = arith.constant 0 : i32
    %c0_i32_1 = arith.constant 0 : i32
    return %c0_i32, %c0_i32_0 : i32, i32
  }
  func.func @transform_4(%arg0: i32, %arg1: i32) -> (i32, i32, i32) {
    %c0_i32 = arith.constant 0 : i32
    %c0_i32_0 = arith.constant 0 : i32
    return %arg1, %arg0, %c0_i32 : i32, i32, i32
  }
  func.func @transform_5(%arg0: i32, %arg1: i32) -> (i32, i32, i32) {
    %c1_i32 = arith.constant 1 : i32
    %0 = arith.subi %c1_i32, %arg1 : i32
    %c0_i32 = arith.constant 0 : i32
    %c0_i32_0 = arith.constant 0 : i32
    return %0, %arg0, %c0_i32 : i32, i32, i32
  }
}

</mosaic_0001>

<bundles_post_ra>
// kernel: rnn_lstm_forward.2
= control target key start
LH: loop header
LB: loop body
LE: loop exit
PB: predicated region body
PF: predicated region fallthrough
CT: control target
= control target key end

     0   :  { %s4191_s0 = inlined_call_operand.hbm [shape: bf16[8,8,512], index: 0, kind: input, shape index: {}]   ;;  %s4192_s1 = inlined_call_operand.hbm [shape: bf16[8,8,512], index: 1, kind: input, shape index: {}]   ;;  %s4193_s2 = inlined_call_operand.hbm [shape: f32[128,512], index: 2, kind: input, shape index: {}]   ;;  %s4194_s3 = inlined_call_operand.hbm [shape: f32[128,512], index: 3, kind: input, shape index: {}]   ;;  %s4195_s4 = inlined_call_operand.hbm [shape: f32[8,8,128], index: 4, kind: output, shape index: {0}]   ;;  %s4196_s5 = inlined_call_operand.hbm [shape: f32[8,8,128], index: 5, kind: output, shape index: {1}]  }
   0x1   :  { %4265 = sst [smem:[#allocation59_spill]] %s4191_s0 }
   0x2   :  { %4266 = sst [smem:[#allocation60_spill]] %s4193_s2 }
   0x3   :  { %4267 = sst [smem:[#allocation61_spill]] %s4194_s3 }
   0x4   :  { %11 = vsyncpa [#allocation7], 0 }
   0x5   :  { %13 = vsyncpa [#allocation7 + $0x1], 0 }
   0x6   :  { %14 = vsyncpa [#allocation10], 0 }
   0x7   :  { %16 = vsyncpa [#allocation10 + $0x1], 0 }
   0x8   :  { %17 = vsyncpa [#allocation13], 0 }
   0x9   :  { %18 = vsyncpa [#allocation8], 0 }
   0xa   :  { %20 = vsyncpa [#allocation8 + $0x1], 0 }
   0xb   :  { %21 = vsyncpa [#allocation16], 0 }
   0xc   :  { %23 = vsyncpa [#allocation16 + $0x1], 0  ;;  %s3314_s18 = smov 0   ;;  %s3316_s19 = smov 0  }
   0xd   :  { %s3318_s20 = smov 0   ;;  %s3320_s21 = smov 0  }
   0xe   :  { %s3322_s22 = smov 0   ;;  %s3324_s23 = smov 0  }
   0xf   :  { %s3326_s24 = smov 0   ;;  %s3328_s25 = smov 0  }
  0x10   :  { %s3330_s26 = smov 0  }
  0x11 LB: > { %4268 = sst [smem:[#allocation23_spill]] %s3236_s18  ;;  %s3360_s27 = sadd.s32 4294967295, %s3268_s26   ;;  %s3268_s26 = sphi %s3330_s26, %s29_s26   ;;  %s3264_s25 = sphi %s3328_s25, %s4391_s25   ;;  %s3260_s24 = sphi %s3326_s24, %s4390_s24   ;;  %s3256_s23 = sphi %s3324_s23, %s4389_s23   ;;  %s3252_s22 = sphi %s3322_s22, %s4388_s22   ;;  %s3248_s21 = sphi %s3320_s21, %s4387_s21   ;;  %s3244_s20 = sphi %s3318_s20, %s4386_s20   ;;  %s3240_s19 = sphi %s3316_s19, %s4385_s19   ;;  %s3236_s18 = sphi %s3314_s18, %s4384_s18  }
  0x12   : > { %4269 = sst [smem:[#allocation24_spill]] %s3248_s21  ;;  %s2160_s28 = sadd.s32 4294967294, %s3268_s26  }
  0x13   : > { %p63_p0 = scmp.ne.s32.totalorder %s3252_s22, %s3248_s21  ;;  %p4198_p1 = scmp.eq.s32.totalorder %s3360_s27, 0 }
  0x14   : > { %p93_p2 = scmp.ne.s32.totalorder %s3240_s19, %s3236_s18  ;;  %p167_p5 = scmp.eq.s32.totalorder %s2160_s28, 1 }
  0x15   : > { %p3371_p4 = por %p4198_p1, %p63_p0  ;;  %p2161_p7 = scmp.ge.s32.totalorder %s3268_s26, 1 }
  0x16   : > { %p3377_p6 = por %p93_p2, %p4198_p1  ;;  %p3382_p8 = por %p167_p5, %p63_p0 }
  0x17   : > { %s4270_s29 = scalar_select %p3371_p4, 1, 0 }
  0x18   : > { %s4271_s30 = scalar_select %p3377_p6, 1, 0 }
  0x19   : > { %s4272_s6 = scalar_select %p3382_p8, 1, 0 }
  0x1a   : > { %p3386_p9 = por %p167_p5, %p93_p2  ;;  %p204_p10 = scmp.lt.s32.totalorder %s3268_s26, 3 }
  0x1b   : > { %4273 = sst [smem:[#allocation25_spill]] %s4272_s6  ;;  %s3270_s9 = smov [#allocation11]  }
  0x1c   : > { %s4274_s7 = scalar_select %p3386_p9, 1, 0 }
  0x1d   : > { %p3391_p11 = pnand %p2161_p7, %p204_p10  ;;  %s216_s10 = sshll.u32 %s3270_s9, 4  ;;  %s3395_s10 = int_to_ptr.vmem [resolvable:$true] %s216_s10 }
  0x1e   : > { %4275 = sst [smem:[#allocation26_spill]] %s4274_s7  ;;  %s3271_s12 = smov [#allocation12]  }
  0x1f   : > { %p2765_p12 = pneg %p3391_p11  ;;  %s229_s13 = sshll.u32 %s3271_s12, 4  ;;  %s3406_s13 = int_to_ptr.vmem [resolvable:$true] %s229_s13 }
  0x20   : > { %s4278_s2 = sld [smem:[#allocation60_spill]] }
  0x21   : > { %p3402_p0 = pnand %p2765_p12, %p4198_p1 }
  0x23   : > { %p3004_p5 = pneg %p3402_p0 }
  0x26   : > { %s3002_s16 = scalar_lea.hbm %s4278_s2, 8192 }
  0x27   : > { %p3003_p2 = scmp.ne.s32.totalorder %s4278_s2, %s3002_s16  ;;  %p3009_p12 = scmp.lt.u32.totalorder %s3002_s16, %s4278_s2 }
  0x29   : > { %p3005_p7 = pnand %p3004_p5, %p3003_p2 }
  0x2b   : > { %p3006_p10 = pneg %p3005_p7 }
  0x2d   : > { %p3011_p13 = pnand %p3009_p12, %p3006_p10 }
  0x2f   : > { %3014 = shalt.err (!%p3011_p13)
}
  0x30   : > { %s3015_s12 = scalar_lea.vmem %s3395_s10, 8192  ;;  %p3023_p8 = scmp.lt.s32.totalorder %s3395_s10, %s3395_s10 }
  0x31   : > { %p3016_p1 = scmp.ne.s32.totalorder %s3395_s10, %s3015_s12  ;;  %p3024_p2 = scmp.lt.s32.totalorder %s3015_s12, %s3015_s12 }
  0x33   : > { %p3018_p3 = pnand %p3016_p1, %p3004_p5  ;;  %p3025_p7 = por %p3024_p2, %p3023_p8 }
  0x35   : > { %p3019_p9 = pneg %p3018_p3 }
  0x37   : > { %p3026_p6 = pnand %p3025_p7, %p3019_p9 }
  0x39   : > { %3029 = shalt.err (!%p3026_p6)
}
  0x3a   : > { %s3272_s7 = smov 512   ;;  %s3273_s14 = smov 32  }
  0x3b   : > { %2768 = dma.hbm_to_vmem [thread:$0]  (!%p3402_p0), %s4278_s2, 8192, %s3395_s10, [#allocation10], %s3272_s7, %s3272_s7, %s3273_s14  }
  0x3c   : > { %s4279_s3 = sld [smem:[#allocation61_spill]] }
  0x42   : > { %s3030_s9 = scalar_lea.hbm %s4279_s3, 8192 }
  0x43   : > { %p3031_p1 = scmp.ne.s32.totalorder %s4279_s3, %s3030_s9  ;;  %p3037_p8 = scmp.lt.u32.totalorder %s3030_s9, %s4279_s3 }
  0x45   : > { %p3033_p3 = pnand %p3031_p1, %p3004_p5 }
  0x47   : > { %p3034_p6 = pneg %p3033_p3 }
  0x49   : > { %p3039_p9 = pnand %p3037_p8, %p3034_p6 }
  0x4b   : > { %3042 = shalt.err (!%p3039_p9)
}
  0x4c   : > { %s3043_s10 = scalar_lea.vmem %s3406_s13, 8192  ;;  %p3051_p2 = scmp.lt.s32.totalorder %s3406_s13, %s3406_s13 }
  0x4d   : > { %p3044_p13 = scmp.ne.s32.totalorder %s3406_s13, %s3043_s10  ;;  %p3052_p7 = scmp.lt.s32.totalorder %s3043_s10, %s3043_s10 }
  0x4f   : > { %p3046_p10 = pnand %p3044_p13, %p3004_p5  ;;  %p3053_p1 = por %p3052_p7, %p3051_p2 }
  0x51   : > { %p3047_p12 = pneg %p3046_p10 }
  0x53   : > { %p3054_p3 = pnand %p3053_p1, %p3047_p12 }
  0x55   : > { %3057 = shalt.err (!%p3054_p3)
}
  0x56   : > { %2771 = dma.hbm_to_vmem [thread:$0]  (!%p3402_p0), %s4279_s3, 8192, %s3406_s13, [#allocation13], %s3272_s7, %s3272_s7, %s3273_s14  }
  0x57   : > { %s38_s6 = sadd.s32 1, %s3264_s25  ;;  %s50_s11 = sadd.s32 1, %s3256_s23 }
  0x58   : > { %p39_p5 = scmp.ge.s32.totalorder %s38_s6, 2  ;;  %p57_p6 = scmp.ne.s32.totalorder %s3256_s23, %s3252_s22 }
  0x59   : > { %p4204_p8 = scmp.eq.s32.totalorder %s3268_s26, 0  ;;  %p4281_p13 = scmp.eq.s32.totalorder %s3360_s27, 1 }
  0x5a   : > { %s4393_s6 = smov (%p39_p5, %s38_s6), 0  ;;  %p4203_p0 = scmp.lt.s32.totalorder %s3268_s26, 2 }
  0x5b   : > { %p3469_p9 = por %p4204_p8, %p57_p6  ;;  %p3475_p10 = por %p4281_p13, %p57_p6 }
  0x5c   : > { %s45_s13 = ssub.s32 %s3264_s25, %s4393_s6  ;;  %s243_s7 = sand.u32 1, %s3256_s23  }
  0x5d   : > { %s4282_s16 = scalar_select %p3475_p10, 1, 0 }
  0x5e   : > { %p48_p12 = scmp.eq.s32.totalorder %s45_s13, 0  ;;  %s2165_s14 = sshll.u32 %s243_s7, 6 }
  0x5f   : > { %s2232_s28 = sshll.u32 %s3264_s25, 10  ;;  %s4283_s0 = sld [smem:[#allocation59_spill]] }
  0x60   : > { %s3484_s17 = scalar_select %p48_p12, %s3256_s23, %s50_s11  }
  0x61   : > { %s247_s18 = scalar_lea.vmem [#allocation6], %s2165_s14  ;;  %p3498_p2 = pnand %p4203_p0, %p3469_p9 }
  0x62   : > { %s257_s21 = sshll.u32 %s247_s18, 4  ;;  %s3502_s11 = scalar_lea.sflag [#allocation7], %s243_s7  ;;  %s3492_s21 = int_to_ptr.vmem [resolvable:$true] %s257_s21 }
  0x63   : > { %p3060_p1 = pneg %p3498_p2 }
  0x65   : > { %s3490_s10 = scalar_lea.hbm %s4283_s0, %s2232_s28  ;;  %s3063_s15 = scalar_lea.hbm %s4283_s0, 2048 }
  0x66   : > { %s3058_s28 = scalar_lea.hbm %s3490_s10, 1024  ;;  %p3064_p6 = scmp.lt.u32.totalorder %s3490_s10, %s4283_s0 }
  0x67   : > { %p3059_p7 = scmp.ne.s32.totalorder %s3490_s10, %s3058_s28  ;;  %p3065_p9 = scmp.lt.u32.totalorder %s3063_s15, %s3058_s28 }
  0x68   : > { %p3067_p12 = scmp.lt.u32.totalorder %s3058_s28, %s3490_s10 }
  0x69   : > { %p3061_p3 = pnand %p3060_p1, %p3059_p7  ;;  %p3066_p13 = por %p3065_p9, %p3064_p6 }
  0x6b   : > { %p3062_p5 = pneg %p3061_p3  ;;  %p3068_p0 = por %p3067_p12, %p3066_p13 }
  0x6d   : > { %p3069_p8 = pnand %p3068_p0, %p3062_p5 }
  0x6f   : > { %3072 = shalt.err (!%p3069_p8)
}
  0x70   : > { %s3073_s7 = scalar_lea.vmem %s3492_s21, 1024  ;;  %s3274_s14 = smov [#allocation6]  }
  0x71   : > { %p3074_p7 = scmp.ne.s32.totalorder %s3492_s21, %s3073_s7  ;;  %s3078_s9 = sshll.u32 %s3274_s14, 4  ;;  %s3079_s9 = int_to_ptr.vmem [resolvable:$false] %s3078_s9 }
  0x72   : > { %s3080_s12 = scalar_lea.vmem %s3079_s9, 2048  ;;  %p3081_p4 = scmp.lt.s32.totalorder %s3492_s21, %s3079_s9 }
  0x73   : > { %p3076_p3 = pnand %p3074_p7, %p3060_p1  ;;  %p3082_p6 = scmp.lt.s32.totalorder %s3080_s12, %s3073_s7 }
  0x75   : > { %p3077_p10 = pneg %p3076_p3  ;;  %p3083_p9 = por %p3082_p6, %p3081_p4 }
  0x77   : > { %p3084_p13 = pnand %p3083_p9, %p3077_p10 }
  0x79   : > { %3087 = shalt.err (!%p3084_p13)
}
  0x7a   : > { %s4207_s28 = smov 256   ;;  %s4208_s15 = smov 16  }
  0x7b   : > { %2775 = dma.hbm_to_vmem [thread:$0]  (!%p3498_p2), %s3490_s10, 1024, %s3492_s21, %s3502_s11, %s4207_s28, %s4207_s28, %s4208_s15  }
  0x7c   : > { %s73_s18 = ssub.s32 1, %s3264_s25  ;;  %s74_s7 = ssub.s32 1, %s4393_s6 }
  0x7d   : > { %s80_s14 = sadd.s32 1, %s3244_s20  ;;  %s75_s9 = ssub.s32 %s73_s18, %s74_s7 }
  0x7e   : > { %p87_p4 = scmp.ne.s32.totalorder %s3244_s20, %s3240_s19  ;;  %p78_p8 = scmp.eq.s32.totalorder %s75_s9, 0 }
  0x7f   : > { %s267_s12 = sand.u32 1, %s3268_s26   ;;  %p4285_p10 = scmp.eq.s32.totalorder %s3268_s26, 0 }
  0x80   : > { %p4286_p1 = scmp.eq.s32.totalorder %s3360_s27, 1  ;;  %s269_s2 = sand.u32 1, %s3244_s20  }
  0x81   : > { %p89_p0 = por %p87_p4, %p4285_p10  ;;  %s2169_s3 = sshll.u32 %s269_s2, 6 }
  0x82   : > { %p3543_p5 = por %p4286_p1, %p87_p4  ;;  %s2234_s10 = sshll.u32 %s73_s18, 10 }
  0x83   : > { %s3548_s13 = scalar_select %p78_p8, %s3244_s20, %s80_s14  }
  0x84   : > { %s4287_s0 = scalar_select %p3543_p5, 1, 0 }
  0x85   : > { %s3554_s28 = scalar_lea.hbm %s4192_s1, %s2234_s10  ;;  %s271_s7 = scalar_lea.vmem [#allocation9], %s2169_s3 }
  0x86   : > { %s282_s9 = sshll.u32 %s271_s7, 4  ;;  %p4288_p2 = scmp.lt.s32.totalorder %s3268_s26, 2  ;;  %s3562_s9 = int_to_ptr.vmem [resolvable:$true] %s282_s9 }
  0x87   : > { %s3564_s2 = scalar_lea.sflag [#allocation10], %s267_s12  ;;  %s3088_s18 = scalar_lea.hbm %s3554_s28, 1024 }
  0x88   : > { %p3558_p12 = pnand %p4288_p2, %p89_p0  ;;  %p3089_p7 = scmp.ne.s32.totalorder %s3554_s28, %s3088_s18 }
  0x89   : > { %s3093_s10 = scalar_lea.hbm %s4192_s1, 2048  ;;  %p3094_p13 = scmp.lt.u32.totalorder %s3554_s28, %s4192_s1 }
  0x8a   : > { %p3090_p3 = pneg %p3558_p12  ;;  %p3095_p4 = scmp.lt.u32.totalorder %s3093_s10, %s3088_s18 }
  0x8b   : > { %p3097_p10 = scmp.lt.u32.totalorder %s3088_s18, %s3554_s28 }
  0x8c   : > { %p3091_p6 = pnand %p3090_p3, %p3089_p7  ;;  %p3096_p8 = por %p3095_p4, %p3094_p13 }
  0x8e   : > { %p3092_p9 = pneg %p3091_p6  ;;  %p3098_p0 = por %p3097_p10, %p3096_p8 }
  0x90   : > { %p3099_p1 = pnand %p3098_p0, %p3092_p9 }
  0x92   : > { %3102 = shalt.err (!%p3099_p1)
}
  0x93   : > { %s3103_s12 = scalar_lea.vmem %s3562_s9, 1024  ;;  %s3277_s7 = smov [#allocation9]  }
  0x94   : > { %p3104_p2 = scmp.ne.s32.totalorder %s3562_s9, %s3103_s12  ;;  %s3108_s3 = sshll.u32 %s3277_s7, 4  ;;  %s3109_s3 = int_to_ptr.vmem [resolvable:$false] %s3108_s3 }
  0x95   : > { %s3110_s14 = scalar_lea.vmem %s3109_s3, 2048  ;;  %p3111_p5 = scmp.lt.s32.totalorder %s3562_s9, %s3109_s3 }
  0x96   : > { %p3106_p7 = pnand %p3104_p2, %p3090_p3  ;;  %p3112_p13 = scmp.lt.s32.totalorder %s3110_s14, %s3103_s12 }
  0x98   : > { %p3107_p6 = pneg %p3106_p7  ;;  %p3113_p4 = por %p3112_p13, %p3111_p5 }
  0x9a   : > { %p3114_p8 = pnand %p3113_p4, %p3107_p6 }
  0x9c   : > { %3117 = shalt.err (!%p3114_p8)
}
  0x9d   : > { %s4290_s18 = smov 16   ;;  %s4291_s10 = smov 256  }
  0x9e   : > { %2778 = dma.hbm_to_vmem [thread:$0]  (!%p3558_p12), %s3554_s28, 1024, %s3562_s9, %s3564_s2, %s4291_s10, %s4291_s10, %s4290_s18  }
  0x9f   : > { %294 = sbr.rel (%p3391_p11) target bundleno = 1319 (0x527), region = 36 }
  0xa6   : > { %s3598_s21 = sand.u32 1, %s3252_s22   ;;  %p4292_p5 = scmp.ne.s32.totalorder %s4270_s29, 0 }
  0xa7   : > { %s2174_s11 = sshll.u32 %s3598_s21, 6  ;;  %s297_s12 = scalar_lea.sflag [#allocation7], %s3598_s21 }
  0xa8   : > { %s3602_s7 = scalar_lea.vmem [#allocation6], %s2174_s11 }
  0xa9   : > { %3211 = dma.done.wait (%p4292_p5), %s297_s12, 1024  }
  0xaa   : > { %3213 = vsyncadd (%p4292_p5), %s297_s12, 4294966272  ;;  %s305_s8 = sand.u32 1, %s3360_s27   ;;  %s3610_s28 = sand.u32 1, %s3240_s19  }
  0xab   : > { %s2175_s15 = sshll.u32 %s3610_s28, 6  ;;  %s306_s9 = scalar_lea.sflag [#allocation10], %s305_s8 }
  0xac   : > { %s3613_s2 = scalar_lea.vmem [#allocation9], %s2175_s15  ;;  %p4293_p11 = scmp.ne.s32.totalorder %s4271_s30, 0 }
  0xae   : > { %3215 = dma.done.wait (%p4293_p11), %s306_s9, 1024  }
  0xaf   : > { %3217 = vsyncadd (%p4293_p11), %s306_s9, 4294966272  ;;  %p4294_p12 = scmp.eq.s32.totalorder %s3360_s27, 0 }
  0xb1   : > { %3219 = dma.done.wait (%p4294_p12), [#allocation10], 8192   ;;  %p4295_p3 = pmov %p4294_p12 }
  0xb3   : > { %3221 = vsyncadd (%p4295_p3), [#allocation10], 4294959104  ;;  %p4296_p9 = pmov %p4295_p3 }
  0xb4   : > { %p4297_p10 = pmov %p4295_p3 }
  0xb5   : > { %3223 = dma.done.wait (%p4296_p9), [#allocation13], 8192  }
  0xb6   : > { %3225 = vsyncadd (%p4297_p10), [#allocation13], 4294959104  ;;  %s2178_s29 = sshll.u32 %s3598_s21, 5  ;;  %s2179_s3 = sshll.u32 %s3610_s28, 5 }
  0xb7   : > { %s3629_s14 = scalar_lea.vmem [#allocation14], %s2178_s29  ;;  %s3631_s30 = scalar_lea.vmem [#allocation15], %s2179_s3 }
  0xb8   : > { %p2180_p0 = scmp.ne.s32.totalorder %s3260_s24, 0 }
  0xb9   : > { %v3278_v0 = vmov (!%p2180_p0), 0.0  }
  0xba   : > { %363 = sbr.rel (%p2180_p0) target bundleno = 193 (0xc1), region = 56  ;;  %364 = vst [vmem:[#allocation2] sm:$0xff] (!%p2180_p0), %v3278_v0  ;;  %365 = vst [vmem:[#allocation3] sm:$0xff] (!%p2180_p0), %v3278_v0 }
  0xbb   : > { %366 = vst [vmem:[#allocation4] sm:$0xff] (!%p2180_p0), %v3278_v0  ;;  %367 = vst [vmem:[#allocation5] sm:$0xff] (!%p2180_p0), %v3278_v0 }
  0xc1 PF: > { %v369_v1 = vld [vmem:[#allocation11 + $0x8] sm:$0xff]  ;;  %v368_v3 = vld [vmem:[#allocation11] sm:$0xff]  ;;  %v4210_v8 = vmov 0.0   ;;  %v371_v20 = vld [vmem:[#allocation11 + $0x18] sm:$0xff]  ;;  %s2235_s27 = sshll.u32 %s3260_s24, 9  ;;  %s1976_s18 = sshll.u32 %s3629_s14, 4  ;;  %s4086_s18 = int_to_ptr.vmem [resolvable:$true] %s1976_s18 }
  0xc2   : > { %v373_v2 = vld [vmem:[#allocation11 + $0x28] sm:$0xff]  ;;  %v372_v5 = vld [vmem:[#allocation11 + $0x20] sm:$0xff]  ;;  %567 = vmatprep.mubr.f32.mxu0 %v4210_v8  ;;  %638 = vmatprep.mubr.f32.mxu1 %v4210_v8  ;;  %v375_v21 = vld [vmem:[#allocation11 + $0x38] sm:$0xff]  ;;  %s4084_s12 = scalar_lea.hbm %s4195_s4, %s2235_s27  ;;  %s3118_s8 = scalar_lea.vmem %s4086_s18, 512 }
  0xc3   : > { %v3634_v4 = vpack.c.bf16 %v373_v2, %v369_v1  ;;  %v377_v6 = vld [vmem:[#allocation11 + $0x48] sm:$0xff]  ;;  %v3638_v9 = vpack.c.bf16 %v372_v5, %v368_v3  ;;  %v376_v11 = vld [vmem:[#allocation11 + $0x40] sm:$0xff]  ;;  %v3649_v23 = vpack.c.bf16 %v375_v21, %v371_v20  ;;  %v370_v24 = vld [vmem:[#allocation11 + $0x10] sm:$0xff]  ;;  %p3119_p1 = scmp.ne.s32.totalorder %s4086_s18, %s3118_s8  ;;  %p4374_p2 = scmp.ne.s32.totalorder %s4282_s16, 0 }
  0xc4   : > { %v381_v7 = vld [vmem:[#allocation11 + $0x68] sm:$0xff]  ;;  %v380_v12 = vld [vmem:[#allocation11 + $0x60] sm:$0xff]  ;;  %v374_v25 = vld [vmem:[#allocation11 + $0x30] sm:$0xff]  ;;  %s3280_s15 = smov [#allocation14]  }
  0xc5   : > { %v3640_v10 = vpack.c.bf16 %v381_v7, %v377_v6  ;;  %v385_v13 = vld [vmem:[#allocation11 + $0x88] sm:$0xff]  ;;  %2238 = vmatprep.subr.bf16.mxu0 %v3634_v4  ;;  %v3644_v15 = vpack.c.bf16 %v380_v12, %v376_v11  ;;  %v384_v16 = vld [vmem:[#allocation11 + $0x80] sm:$0xff]  ;;  %v3651_v26 = vpack.c.bf16 %v374_v25, %v370_v24  ;;  %2270 = vmatprep.subr.bf16.mxu1 %v3649_v23  ;;  %v379_v28 = vld [vmem:[#allocation11 + $0x58] sm:$0xff]  ;;  %p3120_p7 = pnand %p3119_p1, %p4374_p2  ;;  %s3122_s9 = sshll.u32 %s3280_s15, 4  ;;  %s3123_s9 = int_to_ptr.vmem [resolvable:$false] %s3122_s9 }
  0xc6   : > { %v389_v14 = vld [vmem:[#allocation11 + $0xa8] sm:$0xff]  ;;  %2240 = vmatpush1.bf16.msra.mxu0 %v3638_v9  ;;  %v388_v17 = vld [vmem:[#allocation11 + $0xa0] sm:$0xff]  ;;  %v383_v29 = vld [vmem:[#allocation11 + $0x78] sm:$0xff]  ;;  %p3125_p13 = scmp.lt.s32.totalorder %s4086_s18, %s3123_s9 }
  0xc7   : > { %2242 = vmatprep.subr.bf16.mxu0 %v3640_v10  ;;  %v3647_v18 = vpack.c.bf16 %v389_v14, %v385_v13  ;;  %v393_v19 = vld [vmem:[#allocation11 + $0xc8] sm:$0xff]  ;;  %v3654_v27 = vpack.c.bf16 %v388_v17, %v384_v16  ;;  %v378_v30 = vld [vmem:[#allocation11 + $0x50] sm:$0xff]  ;;  %v392_v32 = vld [vmem:[#allocation11 + $0xc0] sm:$0xff]  ;;  %2272 = vmatpush1.bf16.msra.mxu1 %v3651_v26  ;;  %v3661_v34 = vpack.c.bf16 %v383_v29, %v379_v28  ;;  %p3121_p6 = pneg %p3120_p7 }
  0xc8   : > { %v397_v22 = vld [vmem:[#allocation11 + $0xe8] sm:$0xff]  ;;  %v396_v33 = vld [vmem:[#allocation11 + $0xe0] sm:$0xff]  ;;  %v382_v35 = vld [vmem:[#allocation11 + $0x70] sm:$0xff] }
  0xc9   : > { %v3658_v31 = vpack.c.bf16 %v397_v22, %v393_v19  ;;  %v401_v36 = vld [vmem:[#allocation11 + $0x108] sm:$0xff]  ;;  %v3663_v38 = vpack.c.bf16 %v382_v35, %v378_v30  ;;  %v387_v39 = vld [vmem:[#allocation11 + $0x98] sm:$0xff]  ;;  %2274 = vmatprep.subr.bf16.mxu1 %v3661_v34  ;;  %v386_v41 = vld [vmem:[#allocation11 + $0x90] sm:$0xff]  ;;  %v3667_v43 = vpack.c.bf16 %v396_v33, %v392_v32 }
  0xca   : > { %2244 = vmatpush1.bf16.msra.mxu0 %v3644_v15  ;;  %v405_v37 = vld [vmem:[#allocation11 + $0x128] sm:$0xff]  ;;  %v391_v40 = vld [vmem:[#allocation11 + $0xb8] sm:$0xff]  ;;  %v390_v42 = vld [vmem:[#allocation11 + $0xb0] sm:$0xff] }
  0xcb   : > { %2246 = vmatprep.subr.bf16.mxu0 %v3647_v18  ;;  %4298 = vst [vmem:[#allocation27_spill] sm:$0xff] %v3658_v31  ;;  %4299 = vst [vmem:[#allocation28_spill] sm:$0xff] %v3667_v43  ;;  %v400_v44 = vld [vmem:[#allocation11 + $0x100] sm:$0xff]  ;;  %v3669_v46 = vpack.c.bf16 %v391_v40, %v387_v39  ;;  %v3672_v47 = vpack.c.bf16 %v405_v37, %v401_v36  ;;  %2276 = vmatpush1.bf16.msra.mxu1 %v3663_v38  ;;  %v409_v48 = vld [vmem:[#allocation11 + $0x148] sm:$0xff] }
  0xcc   : > { %v404_v45 = vld [vmem:[#allocation11 + $0x120] sm:$0xff]  ;;  %v3675_v49 = vpack.c.bf16 %v390_v42, %v386_v41  ;;  %v395_v50 = vld [vmem:[#allocation11 + $0xd8] sm:$0xff]  ;;  %v413_v52 = vld [vmem:[#allocation11 + $0x168] sm:$0xff] }
  0xcd   : > { %4300 = vst [vmem:[#allocation29_spill] sm:$0xff] %v3672_v47  ;;  %v399_v51 = vld [vmem:[#allocation11 + $0xf8] sm:$0xff]  ;;  %2278 = vmatprep.subr.bf16.mxu1 %v3669_v46  ;;  %v394_v54 = vld [vmem:[#allocation11 + $0xd0] sm:$0xff]  ;;  %v3681_v56 = vpack.c.bf16 %v404_v45, %v400_v44  ;;  %v3684_v59 = vpack.c.bf16 %v413_v52, %v409_v48  ;;  %v408_v60 = vld [vmem:[#allocation11 + $0x140] sm:$0xff] }
  0xce   : > { %2248 = vmatpush1.bf16.msra.mxu0 %v3654_v27  ;;  %v3678_v53 = vpack.c.bf16 %v399_v51, %v395_v50  ;;  %v398_v55 = vld [vmem:[#allocation11 + $0xf0] sm:$0xff]  ;;  %v403_v57 = vld [vmem:[#allocation11 + $0x118] sm:$0xff]  ;;  %v412_v61 = vld [vmem:[#allocation11 + $0x160] sm:$0xff] }
  0xcf   : > { %2250 = vmatprep.subr.bf16.mxu0 %v3658_v31  ;;  %4302 = vst [vmem:[#allocation31_spill] sm:$0xff] %v3681_v56  ;;  %v407_v58 = vld [vmem:[#allocation11 + $0x138] sm:$0xff]  ;;  %4303 = vst [vmem:[#allocation32_spill] sm:$0xff] %v3684_v59  ;;  %2280 = vmatpush1.bf16.msra.mxu1 %v3675_v49  ;;  %v417_v62 = vld [vmem:[#allocation11 + $0x188] sm:$0xff]  ;;  %v3687_v63 = vpack.c.bf16 %v398_v55, %v394_v54  ;;  %v3693_v7 = vpack.c.bf16 %v412_v61, %v408_v60 }
  0xd0   : > { %4301 = vst [vmem:[#allocation30_spill] sm:$0xff] %v3678_v53  ;;  %v421_v0 = vld [vmem:[#allocation11 + $0x1a8] sm:$0xff]  ;;  %2282 = vmatprep.subr.bf16.mxu1 %v3678_v53  ;;  %v3690_v1 = vpack.c.bf16 %v407_v58, %v403_v57  ;;  %v402_v2 = vld [vmem:[#allocation11 + $0x110] sm:$0xff]  ;;  %v411_v5 = vld [vmem:[#allocation11 + $0x158] sm:$0xff] }
  0xd1   : > { %4304 = vst [vmem:[#allocation33_spill] sm:$0xff] %v3687_v63  ;;  %v406_v3 = vld [vmem:[#allocation11 + $0x130] sm:$0xff]  ;;  %v415_v6 = vld [vmem:[#allocation11 + $0x178] sm:$0xff]  ;;  %4306 = vst [vmem:[#allocation35_spill] sm:$0xff] %v3693_v7  ;;  %v3696_v11 = vpack.c.bf16 %v421_v0, %v417_v62 }
  0xd2   : > { %2252 = vmatpush1.bf16.msra.mxu0 %v3667_v43  ;;  %4305 = vst [vmem:[#allocation34_spill] sm:$0xff] %v3690_v1  ;;  %v416_v12 = vld [vmem:[#allocation11 + $0x180] sm:$0xff]  ;;  %v425_v14 = vld [vmem:[#allocation11 + $0x1c8] sm:$0xff]  ;;  %v3699_v16 = vpack.c.bf16 %v406_v3, %v402_v2  ;;  %v3702_v19 = vpack.c.bf16 %v415_v6, %v411_v5  ;;  %v410_v20 = vld [vmem:[#allocation11 + $0x150] sm:$0xff] }
  0xd3   : > { %2254 = vmatprep.subr.bf16.mxu0 %v3672_v47  ;;  %4307 = vst [vmem:[#allocation36_spill] sm:$0xff] %v3696_v11  ;;  %v420_v13 = vld [vmem:[#allocation11 + $0x1a0] sm:$0xff]  ;;  %2284 = vmatpush1.bf16.msra.mxu1 %v3687_v63  ;;  %v429_v17 = vld [vmem:[#allocation11 + $0x1e8] sm:$0xff]  ;;  %v414_v21 = vld [vmem:[#allocation11 + $0x170] sm:$0xff] }
  0xd4   : > { %4308 = vst [vmem:[#allocation37_spill] sm:$0xff] %v3699_v16  ;;  %2286 = vmatprep.subr.bf16.mxu1 %v3690_v1  ;;  %4309 = vst [vmem:[#allocation38_spill] sm:$0xff] %v3702_v19  ;;  %v419_v22 = vld [vmem:[#allocation11 + $0x198] sm:$0xff]  ;;  %v3705_v25 = vpack.c.bf16 %v420_v13, %v416_v12  ;;  %v3708_v28 = vpack.c.bf16 %v429_v17, %v425_v14  ;;  %v424_v29 = vld [vmem:[#allocation11 + $0x1c0] sm:$0xff]  ;;  %v3711_v33 = vpack.c.bf16 %v414_v21, %v410_v20 }
  0xd5   : > { %v423_v24 = vld [vmem:[#allocation11 + $0x1b8] sm:$0xff]  ;;  %v428_v30 = vld [vmem:[#allocation11 + $0x1e0] sm:$0xff]  ;;  %v433_v32 = vld [vmem:[#allocation12 + $0x8] sm:$0xff] }
  0xd6   : > { %2256 = vmatpush1.bf16.msra.mxu0 %v3681_v56  ;;  %4310 = vst [vmem:[#allocation39_spill] sm:$0xff] %v3705_v25  ;;  %4311 = vst [vmem:[#allocation40_spill] sm:$0xff] %v3708_v28  ;;  %v437_v35 = vld [vmem:[#allocation12 + $0x28] sm:$0xff]  ;;  %v3714_v36 = vpack.c.bf16 %v423_v24, %v419_v22  ;;  %v418_v37 = vld [vmem:[#allocation11 + $0x190] sm:$0xff]  ;;  %v3717_v42 = vpack.c.bf16 %v428_v30, %v424_v29 }
  0xd7   : > { %2258 = vmatprep.subr.bf16.mxu0 %v3684_v59  ;;  %2288 = vmatpush1.bf16.msra.mxu1 %v3699_v16  ;;  %4312 = vst [vmem:[#allocation41_spill] sm:$0xff] %v3711_v33  ;;  %v422_v39 = vld [vmem:[#allocation11 + $0x1b0] sm:$0xff]  ;;  %v427_v40 = vld [vmem:[#allocation11 + $0x1d8] sm:$0xff]  ;;  %v3720_v44 = vpack.c.bf16 %v437_v35, %v433_v32  ;;  %v432_v45 = vld [vmem:[#allocation12] sm:$0xff] }
  0xd8   : > { %2290 = vmatprep.subr.bf16.mxu1 %v3702_v19  ;;  %4313 = vst [vmem:[#allocation42_spill] sm:$0xff] %v3714_v36  ;;  %v431_v41 = vld [vmem:[#allocation11 + $0x1f8] sm:$0xff]  ;;  %4314 = vst [vmem:[#allocation43_spill] sm:$0xff] %v3717_v42  ;;  %v436_v48 = vld [vmem:[#allocation12 + $0x20] sm:$0xff]  ;;  %v3723_v51 = vpack.c.bf16 %v422_v39, %v418_v37 }
  0xd9   : > { %4315 = vst [vmem:[#allocation44_spill] sm:$0xff] %v3720_v44  ;;  %v441_v50 = vld [vmem:[#allocation12 + $0x48] sm:$0xff]  ;;  %v3726_v54 = vpack.c.bf16 %v431_v41, %v427_v40  ;;  %v426_v55 = vld [vmem:[#allocation11 + $0x1d0] sm:$0xff]  ;;  %v435_v58 = vld [vmem:[#allocation12 + $0x18] sm:$0xff]  ;;  %v3729_v62 = vpack.c.bf16 %v436_v48, %v432_v45 }
  0xda   : > { %2260 = vmatpush1.bf16.msra.mxu0 %v3693_v7  ;;  %4316 = vst [vmem:[#allocation45_spill] sm:$0xff] %v3723_v51  ;;  %v445_v52 = vld [vmem:[#allocation12 + $0x68] sm:$0xff]  ;;  %v430_v57 = vld [vmem:[#allocation11 + $0x1f0] sm:$0xff]  ;;  %v439_v60 = vld [vmem:[#allocation12 + $0x38] sm:$0xff] }
  0xdb   : > { %2262 = vmatprep.subr.bf16.mxu0 %v3696_v11  ;;  %2292 = vmatpush1.bf16.msra.mxu1 %v3711_v33  ;;  %4317 = vst [vmem:[#allocation46_spill] sm:$0xff] %v3726_v54  ;;  %v502_v61 = vld [vmem:[#allocation2] sm:$0xff]  ;;  %v3732_v0 = vpack.c.bf16 %v445_v52, %v441_v50  ;;  %v449_v5 = vld [vmem:[#allocation12 + $0x88] sm:$0xff]  ;;  %v3735_v6 = vpack.c.bf16 %v430_v57, %v426_v55  ;;  %v434_v14 = vld [vmem:[#allocation12 + $0x10] sm:$0xff] }
  0xdc   : > { %2294 = vmatprep.subr.bf16.mxu1 %v3714_v36  ;;  %v440_v2 = vld [vmem:[#allocation12 + $0x40] sm:$0xff]  ;;  %v453_v12 = vld [vmem:[#allocation12 + $0xa8] sm:$0xff]  ;;  %v3738_v13 = vpack.c.bf16 %v439_v60, %v435_v58  ;;  %v438_v17 = vld [vmem:[#allocation12 + $0x30] sm:$0xff] }
  0xdd   : > { %v444_v3 = vld [vmem:[#allocation12 + $0x60] sm:$0xff]  ;;  %4318 = vst [vmem:[#allocation47_spill] sm:$0xff] %v3735_v6  ;;  %v443_v20 = vld [vmem:[#allocation12 + $0x58] sm:$0xff]  ;;  %v3745_v24 = vpack.c.bf16 %v453_v12, %v449_v5  ;;  %v457_v32 = vld [vmem:[#allocation12 + $0xc8] sm:$0xff]  ;;  %v3748_v35 = vpack.c.bf16 %v438_v17, %v434_v14 }
  0xde   : > { %2264 = vmatpush1.bf16.msra.mxu0 %v3705_v25  ;;  %4319 = vst [vmem:[#allocation48_spill] sm:$0xff] %v3738_v13  ;;  %v447_v21 = vld [vmem:[#allocation12 + $0x78] sm:$0xff]  ;;  %v3741_v22 = vpack.c.bf16 %v444_v3, %v440_v2  ;;  %v448_v29 = vld [vmem:[#allocation12 + $0x80] sm:$0xff]  ;;  %v461_v37 = vld [vmem:[#allocation12 + $0xe8] sm:$0xff] }
  0xdf   : > { %2266 = vmatprep.subr.bf16.mxu0 %v3708_v28  ;;  %2296 = vmatpush1.bf16.msra.mxu1 %v3723_v51  ;;  %v452_v30 = vld [vmem:[#allocation12 + $0xa0] sm:$0xff]  ;;  %v3751_v39 = vpack.c.bf16 %v447_v21, %v443_v20  ;;  %v442_v40 = vld [vmem:[#allocation12 + $0x50] sm:$0xff]  ;;  %v451_v45 = vld [vmem:[#allocation12 + $0x98] sm:$0xff]  ;;  %v3757_v52 = vpack.c.bf16 %v461_v37, %v457_v32 }
  0xe0   : > { %2298 = vmatprep.subr.bf16.mxu1 %v3726_v54  ;;  %v446_v41 = vld [vmem:[#allocation12 + $0x70] sm:$0xff]  ;;  %v455_v48 = vld [vmem:[#allocation12 + $0xb8] sm:$0xff]  ;;  %v3754_v50 = vpack.c.bf16 %v452_v30, %v448_v29  ;;  %v456_v55 = vld [vmem:[#allocation12 + $0xc0] sm:$0xff] }
  0xe1   : > { %4320 = vst [vmem:[#allocation49_spill] sm:$0xff] %v3757_v52  ;;  %v460_v57 = vld [vmem:[#allocation12 + $0xe0] sm:$0xff]  ;;  %v465_v58 = vld [vmem:[#allocation12 + $0x108] sm:$0xff]  ;;  %v3760_v60 = vpack.c.bf16 %v446_v41, %v442_v40  ;;  %v3763_v3 = vpack.c.bf16 %v455_v48, %v451_v45  ;;  %v450_v5 = vld [vmem:[#allocation12 + $0x90] sm:$0xff] }
  0xe2   : > { %2268 = vmatpush1.bf16.msra.mxu0 %v3717_v42  ;;  %v469_v2 = vld [vmem:[#allocation12 + $0x128] sm:$0xff]  ;;  %v454_v12 = vld [vmem:[#allocation12 + $0xb0] sm:$0xff]  ;;  %v463_v14 = vld [vmem:[#allocation12 + $0xf8] sm:$0xff]  ;;  %v3767_v17 = vpack.c.bf16 %v460_v57, %v456_v55 }
  0xe3   : > { %2302 = vmatprep.subr.bf16.mxu0 %v3720_v44  ;;  %2300 = vmatpush1.bf16.msra.mxu1 %v3735_v6  ;;  %v3770_v20 = vpack.c.bf16 %v469_v2, %v465_v58  ;;  %v464_v21 = vld [vmem:[#allocation12 + $0x100] sm:$0xff]  ;;  %v473_v30 = vld [vmem:[#allocation12 + $0x148] sm:$0xff]  ;;  %v3773_v32 = vpack.c.bf16 %v454_v12, %v450_v5  ;;  %v458_v41 = vld [vmem:[#allocation12 + $0xd0] sm:$0xff] }
  0xe4   : > { %2334 = vmatprep.subr.bf16.mxu1 %v3738_v13  ;;  %4321 = vst [vmem:[#allocation50_spill] sm:$0xff] %v3767_v17  ;;  %v468_v29 = vld [vmem:[#allocation12 + $0x120] sm:$0xff]  ;;  %v477_v37 = vld [vmem:[#allocation12 + $0x168] sm:$0xff]  ;;  %v462_v45 = vld [vmem:[#allocation12 + $0xf0] sm:$0xff] }
  0xe5   : > { %568 = vmatmul.mubr.f32.vlgmr.msra.gmra.mrb[0].mxu0 %v502_v61  ;;  %4322 = vst [vmem:[#allocation51_spill] sm:$0xff] %v3770_v20  ;;  %4323 = vst [vmem:[#allocation52_spill] sm:$0xff] %v3773_v32  ;;  %v467_v48 = vld [vmem:[#allocation12 + $0x118] sm:$0xff]  ;;  %v3779_v57 = vpack.c.bf16 %v468_v29, %v464_v21  ;;  %v3782_v58 = vpack.c.bf16 %v477_v37, %v473_v30  ;;  %v472_v2 = vld [vmem:[#allocation12 + $0x140] sm:$0xff] }
  0xe6   : > { %2304 = vmatpush1.bf16.msra.mxu0 %v3729_v62  ;;  %721 = vmatprep.mubr.f32.mxu0 %v4210_v8  ;;  %v471_v55 = vld [vmem:[#allocation12 + $0x138] sm:$0xff]  ;;  %v476_v5 = vld [vmem:[#allocation12 + $0x160] sm:$0xff]  ;;  %v481_v12 = vld [vmem:[#allocation12 + $0x188] sm:$0xff] }
  0xe7   : > { %2306 = vmatprep.subr.bf16.mxu0 %v3732_v0  ;;  %639 = vmatmul.mubr.f32.vlgmr.msra.gmra.mrb[0].mxu1 %v502_v61  ;;  %v459_v61 = vld [vmem:[#allocation12 + $0xd8] sm:$0xff]  ;;  %4325 = vst [vmem:[#allocation54_spill] sm:$0xff] %v3779_v57  ;;  %4326 = vst [vmem:[#allocation55_spill] sm:$0xff] %v3782_v58  ;;  %v3791_v30 = vpack.c.bf16 %v476_v5, %v472_v2 }
  0xe8   : > { %2336 = vmatpush1.bf16.msra.mxu1 %v3748_v35  ;;  %792 = vmatprep.mubr.f32.mxu1 %v4210_v8  ;;  %v3776_v40 = vpack.c.bf16 %v463_v14, %v459_v61  ;;  %v3785_v8 = vpack.c.bf16 %v462_v45, %v458_v41  ;;  %v485_v61 = vld [vmem:[#allocation12 + $0x1a8] sm:$0xff]  ;;  %v3788_v14 = vpack.c.bf16 %v471_v55, %v467_v48  ;;  %v475_v21 = vld [vmem:[#allocation12 + $0x158] sm:$0xff]  ;;  %v484_v41 = vld [vmem:[#allocation12 + $0x1a0] sm:$0xff] }
  0xe9   : > { %2338 = vmatprep.subr.bf16.mxu1 %v3751_v39  ;;  %v479_v29 = vld [vmem:[#allocation12 + $0x178] sm:$0xff]  ;;  %4329 = vst [vmem:[#allocation58_spill] sm:$0xff] %v3791_v30  ;;  %v3794_v37 = vpack.c.bf16 %v485_v61, %v481_v12  ;;  %v489_v45 = vld [vmem:[#allocation12 + $0x1c8] sm:$0xff] }
  0xea   : > { %2308 = vmatpush1.bf16.msra.mxu0 %v3741_v22  ;;  %4324 = vst [vmem:[#allocation53_spill] sm:$0xff] %v3776_v40  ;;  %4327 = vst [vmem:[#allocation56_spill] sm:$0xff] %v3785_v8  ;;  %v493_v48 = vld [vmem:[#allocation12 + $0x1e8] sm:$0xff]  ;;  %v3800_v55 = vpack.c.bf16 %v479_v29, %v475_v21  ;;  %v483_v2 = vld [vmem:[#allocation12 + $0x198] sm:$0xff] }
  0xeb   : > { %2310 = vmatprep.subr.bf16.mxu0 %v3745_v24  ;;  %4328 = vst [vmem:[#allocation57_spill] sm:$0xff] %v3788_v14  ;;  %v487_v5 = vld [vmem:[#allocation12 + $0x1b8] sm:$0xff]  ;;  %v3806_v61 = vpack.c.bf16 %v493_v48, %v489_v45  ;;  %v482_v29 = vld [vmem:[#allocation12 + $0x190] sm:$0xff] }
  0xec   : > { %2340 = vmatpush1.bf16.msra.mxu1 %v3760_v60  ;;  %v3812_v21 = vpack.c.bf16 %v487_v5, %v483_v2  ;;  %v494_v45 = vld [vmem:[#allocation12 + $0x1f0] sm:$0xff] }
  0xed   : > { %2342 = vmatprep.subr.bf16.mxu1 %v3763_v3  ;;  %v656_v48 = vld [vmem:[#allocation4] sm:$0xff] }
  0xee   : > { %2312 = vmatpush1.bf16.msra.mxu0 %v3754_v50 }
  0xef   : > { %2314 = vmatprep.subr.bf16.mxu0 %v3757_v52  ;;  %v466_v52 = vld [vmem:[#allocation12 + $0x110] sm:$0xff] }
  0xf0   : > { %2344 = vmatpush1.bf16.msra.mxu1 %v3773_v32  ;;  %v474_v32 = vld [vmem:[#allocation12 + $0x150] sm:$0xff] }
  0xf1   : > { %2346 = vmatprep.subr.bf16.mxu1 %v3776_v40 }
  0xf2   : > { %2316 = vmatpush1.bf16.msra.mxu0 %v3767_v17  ;;  %v470_v17 = vld [vmem:[#allocation12 + $0x130] sm:$0xff] }
  0xf3   : > { %2318 = vmatprep.subr.bf16.mxu0 %v3770_v20  ;;  %v480_v20 = vld [vmem:[#allocation12 + $0x180] sm:$0xff]  ;;  %v3797_v40 = vpack.c.bf16 %v470_v17, %v466_v52 }
  0xf4   : > { %2348 = vmatpush1.bf16.msra.mxu1 %v3785_v8  ;;  %v3803_v12 = vpack.c.bf16 %v484_v41, %v480_v20  ;;  %v492_v52 = vld [vmem:[#allocation12 + $0x1e0] sm:$0xff]  ;;  %v491_v8 = vld [vmem:[#allocation12 + $0x1d8] sm:$0xff] }
  0xf5   : > { %2350 = vmatprep.subr.bf16.mxu1 %v3788_v14  ;;  %v486_v14 = vld [vmem:[#allocation12 + $0x1b0] sm:$0xff] }
  0xf6   : > { %2320 = vmatpush1.bf16.msra.mxu0 %v3779_v57  ;;  %v478_v57 = vld [vmem:[#allocation12 + $0x170] sm:$0xff]  ;;  %v3819_v41 = vpack.c.bf16 %v486_v14, %v482_v29 }
  0xf7   : > { %2322 = vmatprep.subr.bf16.mxu0 %v3782_v58  ;;  %v488_v58 = vld [vmem:[#allocation12 + $0x1c0] sm:$0xff]  ;;  %v3809_v17 = vpack.c.bf16 %v478_v57, %v474_v32  ;;  %v490_v57 = vld [vmem:[#allocation12 + $0x1d0] sm:$0xff] }
  0xf8   : > { %2352 = vmatpush1.bf16.msra.mxu1 %v3797_v40  ;;  %v3815_v20 = vpack.c.bf16 %v492_v52, %v488_v58  ;;  %v3826_v2 = vpack.c.bf16 %v494_v45, %v490_v57  ;;  %v4330_v58 = vmov 0.0   ;;  %v497_v52 = vld [vmem:[%s3602_s7 + $0x8] sm:$0xff] }
  0xf9   : > { %2354 = vmatprep.subr.bf16.mxu1 %v3800_v55 }
  0xfa   : > { %2324 = vmatpush1.bf16.msra.mxu0 %v3791_v30  ;;  %v495_v30 = vld [vmem:[#allocation12 + $0x1f8] sm:$0xff] }
  0xfb   : > { %2326 = vmatprep.subr.bf16.mxu0 %v3794_v37  ;;  %v3822_v32 = vpack.c.bf16 %v495_v30, %v491_v8  ;;  %v496_v8 = vld [vmem:[%s3602_s7] sm:$0xff] }
  0xfc   : > { %2356 = vmatpush1.bf16.msra.mxu1 %v3809_v17  ;;  %v498_v14 = vunpack.c.l.bf16 %v496_v8  ;;  %v499_v30 = vunpack.c.h.bf16 %v496_v8 }
  0xfd   : > { %2358 = vmatprep.subr.bf16.mxu1 %v3812_v21 }
  0xfe   : > { %2328 = vmatpush1.bf16.msra.mxu0 %v3803_v12 }
  0xff   : > { %2330 = vmatprep.subr.bf16.mxu0 %v3806_v61 }
 0x100   : > { %2360 = vmatpush1.bf16.msra.mxu1 %v3819_v41 }
 0x101   : > { %2362 = vmatprep.subr.bf16.mxu1 %v3822_v32 }
 0x102   : > { %2332 = vmatpush1.bf16.msra.mxu0 %v3815_v20 }
 0x103   : > { %2366 = vmatprep.subr.bf16.mxu0 %v3634_v4 }
 0x104   : > { %2364 = vmatpush1.bf16.msra.mxu1 %v3826_v2 }
 0x105   : > { %722 = vmatmul.mubr.f32.vlgmr.msra.gmra.mrb[2].mxu0 %v656_v48  ;;  %2398 = vmatprep.subr.bf16.mxu1 %v3649_v23 }
 0x106   : > { %2368 = vmatpush1.bf16.msra.mxu0 %v3638_v9  ;;  %932 = vmatprep.mubr.f32.mxu0 %v4330_v58 }
 0x107   : > { %2370 = vmatprep.subr.bf16.mxu0 %v3640_v10  ;;  %793 = vmatmul.mubr.f32.vlgmr.msra.gmra.mrb[2].mxu1 %v656_v48 }
 0x108   : > { %2400 = vmatpush1.bf16.msra.mxu1 %v3651_v26  ;;  %1003 = vmatprep.mubr.f32.mxu1 %v4330_v58 }
 0x109   : > { %2402 = vmatprep.subr.bf16.mxu1 %v3661_v34 }
 0x10a   : > { %2372 = vmatpush1.bf16.msra.mxu0 %v3644_v15 }
 0x10b   : > { %2374 = vmatprep.subr.bf16.mxu0 %v3647_v18 }
 0x10c   : > { %2404 = vmatpush1.bf16.msra.mxu1 %v3663_v38 }
 0x10d   : > { %2406 = vmatprep.subr.bf16.mxu1 %v3669_v46 }
 0x10e   : > { %2376 = vmatpush1.bf16.msra.mxu0 %v3654_v27 }
 0x10f   : > { %2378 = vmatprep.subr.bf16.mxu0 %v3658_v31 }
 0x110   : > { %2408 = vmatpush1.bf16.msra.mxu1 %v3675_v49 }
 0x111   : > { %2410 = vmatprep.subr.bf16.mxu1 %v3678_v53 }
 0x112   : > { %2380 = vmatpush1.bf16.msra.mxu0 %v3667_v43 }
 0x113   : > { %2382 = vmatprep.subr.bf16.mxu0 %v3672_v47 }
 0x114   : > { %2412 = vmatpush1.bf16.msra.mxu1 %v3687_v63 }
 0x115   : > { %2414 = vmatprep.subr.bf16.mxu1 %v3690_v1 }
 0x116   : > { %2384 = vmatpush1.bf16.msra.mxu0 %v3681_v56 }
 0x117   : > { %2386 = vmatprep.subr.bf16.mxu0 %v3684_v59 }
 0x118   : > { %2416 = vmatpush1.bf16.msra.mxu1 %v3699_v16 }
 0x119   : > { %2418 = vmatprep.subr.bf16.mxu1 %v3702_v19 }
 0x11a   : > { %2388 = vmatpush1.bf16.msra.mxu0 %v3693_v7 }
 0x11b   : > { %2390 = vmatprep.subr.bf16.mxu0 %v3696_v11 }
 0x11c   : > { %2420 = vmatpush1.bf16.msra.mxu1 %v3711_v33 }
 0x11d   : > { %2422 = vmatprep.subr.bf16.mxu1 %v3714_v36 }
 0x11e   : > { %2392 = vmatpush1.bf16.msra.mxu0 %v3705_v25 }
 0x11f   : > { %2394 = vmatprep.subr.bf16.mxu0 %v3708_v28 }
 0x120   : > { %2424 = vmatpush1.bf16.msra.mxu1 %v3723_v51 }
 0x121   : > { %2426 = vmatprep.subr.bf16.mxu1 %v3726_v54 }
 0x122   : > { %2396 = vmatpush1.bf16.msra.mxu0 %v3717_v42  ;;  %v500_v42 = vunpack.c.l.bf16 %v497_v52 }
 0x123   : > { %2430 = vmatprep.subr.bf16.mxu0 %v3720_v44 }
 0x124   : > { %2428 = vmatpush1.bf16.msra.mxu1 %v3735_v6  ;;  %v501_v6 = vunpack.c.h.bf16 %v497_v52 }
 0x125   : > { %2462 = vmatprep.subr.bf16.mxu1 %v3738_v13 }
 0x1b8   : > { %v569_v5 = vpop.f32.mrb[0].mxu0 }
 0x1b9   : > { %v645_v29 = vadd.f32 %v569_v5, %v498_v14  ;;  %v571_v57 = vpop.f32.mrb[1].mxu0 }
 0x1ba   : > { %v646_v45 = vadd.f32 %v571_v57, %v499_v30  ;;  %v640_v51 = vpop.f32.mrb[0].mxu1  ;;  %v803_v57 = vld [vmem:[#allocation3] sm:$0xff] }
 0x1bb   : > { %v2183_v48 = vmul.f32 -1.442695, %v645_v29  ;;  %v642_v44 = vpop.f32.mrb[1].mxu1  ;;  %v647_v54 = vadd.f32 %v640_v51, %v500_v42  ;;  %v2181_v29 = vld [vmem:[%s3613_s2 + $0x30] sm:$0xff] }
 0x1bc   : > { %v2184_v28 = vmul.f32 -1.442695, %v646_v45  ;;  %v648_v13 = vadd.f32 %v642_v44, %v501_v6  ;;  %v652_v51 = vunpack.c.l.bf16 %v2181_v29  ;;  %v653_v44 = vunpack.c.h.bf16 %v2181_v29  ;;  %v2182_v6 = vld [vmem:[%s3613_s2 + $0x38] sm:$0xff] }
 0x1bd   : > { %2874 = vpow2.f32 %v2183_v48  ;;  %v2185_v25 = vmul.f32 -1.442695, %v647_v54  ;;  %v655_v29 = vunpack.c.h.bf16 %v2182_v6 }
 0x1be   : > { %2876 = vpow2.f32 %v2184_v28 }
 0x1bf   : > { %2878 = vpow2.f32 %v2185_v25 }
 0x1c0   : > { %2880 = vtanh.f32 %v648_v13 }
 0x1c7   : > { %v2875_v36 = vpop.eup %2874 }
 0x1c8   : > { %v2877_v8 = vpop.eup %2876  ;;  %v813_v11 = vadd.f32 1.0, %v2875_v36 }
 0x1c9   : > { %v814_v14 = vadd.f32 1.0, %v2877_v8  ;;  %v2879_v30 = vpop.eup %2878 }
 0x1ca   : > { %2882 = vrcp.f32 %v813_v11  ;;  %v2881_v5 = vpop.eup %2880  ;;  %v815_v45 = vadd.f32 1.0, %v2879_v30 }
 0x1cb   : > { %2884 = vrcp.f32 %v814_v14  ;;  %v654_v14 = vunpack.c.l.bf16 %v2182_v6  ;;  %v4331_v6 = vld [vmem:[#allocation52_spill] sm:$0xff] }
 0x1cc   : > { %2886 = vrcp.f32 %v815_v45 }
 0x1d4   : > { %v2883_v28 = vpop.eup %2882 }
 0x1d5   : > { %v2885_v48 = vpop.eup %2884  ;;  %v824_v42 = vmul.f32 %v2883_v28, %v2881_v5 }
 0x1d6   : > { %v823_v54 = vmul.f32 %v2885_v48, %v803_v57  ;;  %v2887_v28 = vpop.eup %2886 }
 0x1d8   : > { %v3869_v25 = vadd.f32 %v824_v42, %v823_v54  ;;  %v723_v36 = vpop.f32.mrb[2].mxu0 }
 0x1d9   : > { %v799_v13 = vadd.f32 %v723_v36, %v652_v51  ;;  %v725_v11 = vpop.f32.mrb[3].mxu0 }
 0x1da   : > { %2888 = vtanh.f32 %v3869_v25  ;;  %v800_v52 = vadd.f32 %v725_v11, %v653_v44  ;;  %v794_v30 = vpop.f32.mrb[2].mxu1  ;;  %v4332_v11 = vld [vmem:[#allocation49_spill] sm:$0xff] }
 0x1db   : > { %v2186_v8 = vmul.f32 -1.442695, %v799_v13  ;;  %v796_v5 = vpop.f32.mrb[3].mxu1  ;;  %v801_v57 = vadd.f32 %v794_v30, %v654_v14  ;;  %v828_v14 = vld [vmem:[#allocation5] sm:$0xff] }
 0x1dc   : > { %v2187_v33 = vmul.f32 -1.442695, %v800_v52  ;;  %v802_v42 = vadd.f32 %v796_v5, %v655_v29  ;;  %v4333_v52 = vld [vmem:[#allocation53_spill] sm:$0xff]  ;;  %v4335_v29 = vld [vmem:[#allocation56_spill] sm:$0xff] }
 0x1dd   : > { %2890 = vpow2.f32 %v2186_v8  ;;  %v2188_v45 = vmul.f32 -1.442695, %v801_v57  ;;  %v4334_v57 = vld [vmem:[#allocation50_spill] sm:$0xff] }
 0x1de   : > { %2892 = vpow2.f32 %v2187_v33 }
 0x1df   : > { %2894 = vpow2.f32 %v2188_v45 }
 0x1e0   : > { %2896 = vtanh.f32 %v802_v42  ;;  %v4337_v42 = vld [vmem:[#allocation57_spill] sm:$0xff] }
 0x1e4   : > { %v2889_v48 = vpop.eup %2888 }
 0x1e5   : > { %v827_v54 = vmul.f32 %v2889_v48, %v2887_v28  ;;  %v4336_v48 = vld [vmem:[#allocation51_spill] sm:$0xff] }
 0x1e7   : > { %v2891_v51 = vpop.eup %2890  ;;  %857 = vst [vmem:[%s3629_s14] sm:$0xff] %v827_v54  ;;  %933 = vmatmul.mubr.f32.vlgmr.msra.gmra.mrb[4].mxu0 %v827_v54  ;;  %1004 = vmatmul.mubr.f32.vlgmr.msra.gmra.mrb[4].mxu1 %v827_v54 }
 0x1e8   : > { %v2893_v44 = vpop.eup %2892  ;;  %v838_v36 = vadd.f32 1.0, %v2891_v51  ;;  %2432 = vmatpush1.bf16.msra.mxu0 %v3729_v62  ;;  %2464 = vmatpush1.bf16.msra.mxu1 %v3748_v35 }
 0x1e9   : > { %v839_v33 = vadd.f32 1.0, %v2893_v44  ;;  %2434 = vmatprep.subr.bf16.mxu0 %v3732_v0  ;;  %2466 = vmatprep.subr.bf16.mxu1 %v3751_v39  ;;  %v2895_v13 = vpop.eup %2894  ;;  %v4338_v44 = vld [vmem:[#allocation54_spill] sm:$0xff] }
 0x1ea   : > { %2898 = vrcp.f32 %v838_v36  ;;  %1086 = vmatprep.mubr.f32.mxu0 %v4330_v58  ;;  %1157 = vmatprep.mubr.f32.mxu1 %v4330_v58  ;;  %v2897_v8 = vpop.eup %2896  ;;  %v840_v5 = vadd.f32 1.0, %v2895_v13  ;;  %v4339_v36 = vld [vmem:[#allocation55_spill] sm:$0xff] }
 0x1eb   : > { %2900 = vrcp.f32 %v839_v33  ;;  %v4340_v33 = vld [vmem:[#allocation58_spill] sm:$0xff] }
 0x1ec   : > { %2436 = vmatpush1.bf16.msra.mxu0 %v3741_v22  ;;  %2468 = vmatpush1.bf16.msra.mxu1 %v3760_v60  ;;  %2902 = vrcp.f32 %v840_v5  ;;  %v4342_v5 = vld [vmem:[#allocation36_spill] sm:$0xff] }
 0x1ed   : > { %2438 = vmatprep.subr.bf16.mxu0 %v3745_v24  ;;  %2470 = vmatprep.subr.bf16.mxu1 %v3763_v3 }
 0x1f0   : > { %2440 = vmatpush1.bf16.msra.mxu0 %v3754_v50  ;;  %2472 = vmatpush1.bf16.msra.mxu1 %v4331_v6 }
 0x1f1   : > { %2442 = vmatprep.subr.bf16.mxu0 %v4332_v11  ;;  %2474 = vmatprep.subr.bf16.mxu1 %v4333_v52 }
 0x1f4   : > { %v2899_v30 = vpop.eup %2898  ;;  %2444 = vmatpush1.bf16.msra.mxu0 %v4334_v57  ;;  %2476 = vmatpush1.bf16.msra.mxu1 %v4335_v29 }
 0x1f5   : > { %v2901_v28 = vpop.eup %2900  ;;  %v849_v45 = vmul.f32 %v2899_v30, %v2897_v8  ;;  %2446 = vmatprep.subr.bf16.mxu0 %v4336_v48  ;;  %2478 = vmatprep.subr.bf16.mxu1 %v4337_v42  ;;  %v4341_v30 = vld [vmem:[#allocation41_spill] sm:$0xff] }
 0x1f6   : > { %v848_v54 = vmul.f32 %v2901_v28, %v828_v14  ;;  %v2903_v13 = vpop.eup %2902  ;;  %v4343_v28 = vld [vmem:[#allocation42_spill] sm:$0xff] }
 0x1f8   : > { %v3892_v51 = vadd.f32 %v849_v45, %v848_v54  ;;  %2448 = vmatpush1.bf16.msra.mxu0 %v4338_v44  ;;  %2480 = vmatpush1.bf16.msra.mxu1 %v3797_v40  ;;  %v4344_v45 = vld [vmem:[#allocation39_spill] sm:$0xff]  ;;  %v4345_v54 = vld [vmem:[#allocation45_spill] sm:$0xff] }
 0x1f9   : > { %2450 = vmatprep.subr.bf16.mxu0 %v4339_v36  ;;  %2482 = vmatprep.subr.bf16.mxu1 %v3800_v55 }
 0x1fa   : > { %2904 = vtanh.f32 %v3892_v51 }
 0x1fc   : > { %2452 = vmatpush1.bf16.msra.mxu0 %v4340_v33  ;;  %2484 = vmatpush1.bf16.msra.mxu1 %v3809_v17 }
 0x1fd   : > { %2454 = vmatprep.subr.bf16.mxu0 %v3794_v37  ;;  %2486 = vmatprep.subr.bf16.mxu1 %v3812_v21 }
 0x200   : > { %2456 = vmatpush1.bf16.msra.mxu0 %v3803_v12  ;;  %2488 = vmatpush1.bf16.msra.mxu1 %v3819_v41 }
 0x201   : > { %2458 = vmatprep.subr.bf16.mxu0 %v3806_v61  ;;  %2490 = vmatprep.subr.bf16.mxu1 %v3822_v32 }
 0x204   : > { %v2905_v8 = vpop.eup %2904  ;;  %2460 = vmatpush1.bf16.msra.mxu0 %v3815_v20  ;;  %2492 = vmatpush1.bf16.msra.mxu1 %v3826_v2 }
 0x205   : > { %v852_v14 = vmul.f32 %v2905_v8, %v2903_v13  ;;  %2494 = vmatprep.subr.bf16.mxu0 %v3634_v4  ;;  %2526 = vmatprep.subr.bf16.mxu1 %v3649_v23  ;;  %v4346_v13 = vld [vmem:[#allocation40_spill] sm:$0xff]  ;;  %v4347_v8 = vld [vmem:[#allocation46_spill] sm:$0xff] }
 0x207   : > { %2189 = vst [vmem:[%s3631_s30 + $0x18] sm:$0xff] %v852_v14  ;;  %1087 = vmatmul.mubr.f32.vlgmr.msra.gmra.mrb[6].mxu0 %v852_v14  ;;  %1158 = vmatmul.mubr.f32.vlgmr.msra.gmra.mrb[6].mxu1 %v852_v14  ;;  %v4348_v14 = vld [vmem:[#allocation43_spill] sm:$0xff] }
 0x208   : > { %2496 = vmatpush1.bf16.msra.mxu0 %v3638_v9  ;;  %2528 = vmatpush1.bf16.msra.mxu1 %v3651_v26 }
 0x209   : > { %2498 = vmatprep.subr.bf16.mxu0 %v3640_v10  ;;  %2530 = vmatprep.subr.bf16.mxu1 %v3661_v34 }
 0x20a   : > { %1298 = vmatprep.mubr.f32.mxu0 %v4330_v58  ;;  %1369 = vmatprep.mubr.f32.mxu1 %v4330_v58 }
 0x20c   : > { %2500 = vmatpush1.bf16.msra.mxu0 %v3644_v15  ;;  %2532 = vmatpush1.bf16.msra.mxu1 %v3663_v38 }
 0x20d   : > { %2502 = vmatprep.subr.bf16.mxu0 %v3647_v18  ;;  %2534 = vmatprep.subr.bf16.mxu1 %v3669_v46 }
 0x210   : > { %2504 = vmatpush1.bf16.msra.mxu0 %v3654_v27  ;;  %2536 = vmatpush1.bf16.msra.mxu1 %v3675_v49 }
 0x211   : > { %2506 = vmatprep.subr.bf16.mxu0 %v3658_v31  ;;  %2538 = vmatprep.subr.bf16.mxu1 %v3678_v53 }
 0x214   : > { %2508 = vmatpush1.bf16.msra.mxu0 %v3667_v43  ;;  %2540 = vmatpush1.bf16.msra.mxu1 %v3687_v63 }
 0x215   : > { %2510 = vmatprep.subr.bf16.mxu0 %v3672_v47  ;;  %2542 = vmatprep.subr.bf16.mxu1 %v3690_v1  ;;  %v2191_v47 = vld [vmem:[%s3602_s7 + $0x18] sm:$0xff] }
 0x218   : > { %2512 = vmatpush1.bf16.msra.mxu0 %v3681_v56  ;;  %2544 = vmatpush1.bf16.msra.mxu1 %v3699_v16 }
 0x219   : > { %2514 = vmatprep.subr.bf16.mxu0 %v3684_v59  ;;  %2546 = vmatprep.subr.bf16.mxu1 %v3702_v19  ;;  %v4349_v19 = vld [vmem:[#allocation47_spill] sm:$0xff] }
 0x21c   : > { %2516 = vmatpush1.bf16.msra.mxu0 %v3693_v7  ;;  %2548 = vmatpush1.bf16.msra.mxu1 %v4341_v30  ;;  %v4350_v7 = vld [vmem:[#allocation44_spill] sm:$0xff] }
 0x21d   : > { %2518 = vmatprep.subr.bf16.mxu0 %v4342_v5  ;;  %2550 = vmatprep.subr.bf16.mxu1 %v4343_v28  ;;  %v4351_v30 = vld [vmem:[#allocation48_spill] sm:$0xff]  ;;  %v2190_v5 = vld [vmem:[%s3602_s7 + $0x10] sm:$0xff] }
 0x21e   : > { %v863_v59 = vunpack.c.l.bf16 %v2190_v5  ;;  %v864_v28 = vunpack.c.h.bf16 %v2190_v5 }
 0x220   : > { %2520 = vmatpush1.bf16.msra.mxu0 %v4344_v45  ;;  %2552 = vmatpush1.bf16.msra.mxu1 %v4345_v54 }
 0x221   : > { %2522 = vmatprep.subr.bf16.mxu0 %v4346_v13  ;;  %2554 = vmatprep.subr.bf16.mxu1 %v4347_v8 }
 0x224   : > { %2524 = vmatpush1.bf16.msra.mxu0 %v4348_v14  ;;  %2556 = vmatpush1.bf16.msra.mxu1 %v4349_v19  ;;  %v865_v14 = vunpack.c.l.bf16 %v2191_v47  ;;  %v866_v19 = vunpack.c.h.bf16 %v2191_v47 }
 0x225   : > { %2558 = vmatprep.subr.bf16.mxu0 %v4350_v7  ;;  %2590 = vmatprep.subr.bf16.mxu1 %v4351_v30 }
 0x2ba   : > { %v934_v16 = vpop.f32.mrb[4].mxu0  ;;  %v1005_v45 = vpop.f32.mrb[4].mxu1 }
 0x2bb   : > { %v1010_v56 = vadd.f32 %v934_v16, %v863_v59  ;;  %v936_v1 = vpop.f32.mrb[5].mxu0  ;;  %v1007_v54 = vpop.f32.mrb[5].mxu1  ;;  %v1012_v7 = vadd.f32 %v1005_v45, %v865_v14  ;;  %v2193_v14 = vld [vmem:[%s3613_s2 + $0x28] sm:$0xff] }
 0x2bc   : > { %v1011_v13 = vadd.f32 %v936_v1, %v864_v28  ;;  %v1013_v43 = vadd.f32 %v1007_v54, %v866_v19  ;;  %v2192_v1 = vld [vmem:[%s3613_s2 + $0x20] sm:$0xff] }
 0x2bd   : > { %v2194_v63 = vmul.f32 -1.442695, %v1010_v56  ;;  %v2196_v30 = vmul.f32 -1.442695, %v1012_v7  ;;  %v1018_v45 = vunpack.c.h.bf16 %v2192_v1 }
 0x2be   : > { %v2195_v8 = vmul.f32 -1.442695, %v1011_v13  ;;  %v1017_v13 = vunpack.c.l.bf16 %v2192_v1  ;;  %v1020_v1 = vunpack.c.h.bf16 %v2193_v14 }
 0x2bf   : > { %2906 = vpow2.f32 %v2194_v63 }
 0x2c0   : > { %2908 = vpow2.f32 %v2195_v8 }
 0x2c1   : > { %2910 = vtanh.f32 %v1013_v43 }
 0x2c2   : > { %2912 = vpow2.f32 %v2196_v30 }
 0x2c9   : > { %v2907_v53 = vpop.eup %2906 }
 0x2ca   : > { %v1178_v31 = vadd.f32 1.0, %v2907_v53  ;;  %v2909_v5 = vpop.eup %2908 }
 0x2cb   : > { %v1179_v59 = vadd.f32 1.0, %v2909_v5  ;;  %v2911_v16 = vpop.eup %2910 }
 0x2cc   : > { %2914 = vrcp.f32 %v1178_v31  ;;  %v2913_v56 = vpop.eup %2912 }
 0x2cd   : > { %2916 = vrcp.f32 %v1179_v59  ;;  %v1180_v47 = vadd.f32 1.0, %v2913_v56  ;;  %v1019_v56 = vunpack.c.l.bf16 %v2193_v14 }
 0x2cf   : > { %2918 = vrcp.f32 %v1180_v47 }
 0x2d6   : > { %v2915_v63 = vpop.eup %2914 }
 0x2d7   : > { %v1189_v28 = vmul.f32 %v2915_v63, %v2911_v16  ;;  %v2917_v8 = vpop.eup %2916 }
 0x2d8   : > { %v1188_v7 = vmul.f32 %v2917_v8, %v3869_v25 }
 0x2d9   : > { %v2919_v63 = vpop.eup %2918 }
 0x2da   : > { %v1088_v19 = vpop.f32.mrb[6].mxu0  ;;  %v1159_v53 = vpop.f32.mrb[6].mxu1  ;;  %v3950_v43 = vadd.f32 %v1189_v28, %v1188_v7 }
 0x2db   : > { %v1164_v30 = vadd.f32 %v1088_v19, %v1017_v13  ;;  %v1090_v31 = vpop.f32.mrb[7].mxu0  ;;  %v1161_v54 = vpop.f32.mrb[7].mxu1  ;;  %v1166_v25 = vadd.f32 %v1159_v53, %v1019_v56 }
 0x2dc   : > { %v1165_v5 = vadd.f32 %v1090_v31, %v1018_v45  ;;  %2920 = vtanh.f32 %v3950_v43  ;;  %v1167_v8 = vadd.f32 %v1161_v54, %v1020_v1 }
 0x2dd   : > { %v2197_v59 = vmul.f32 -1.442695, %v1164_v30  ;;  %v2199_v7 = vmul.f32 -1.442695, %v1166_v25 }
 0x2de   : > { %v2198_v16 = vmul.f32 -1.442695, %v1165_v5 }
 0x2df   : > { %2922 = vpow2.f32 %v2197_v59 }
 0x2e0   : > { %2924 = vpow2.f32 %v2198_v16 }
 0x2e1   : > { %2926 = vtanh.f32 %v1167_v8  ;;  %v4365_v8 = vld [vmem:[#allocation42_spill] sm:$0xff] }
 0x2e2   : > { %2928 = vpow2.f32 %v2199_v7  ;;  %v4367_v7 = vld [vmem:[#allocation45_spill] sm:$0xff] }
 0x2e6   : > { %v2921_v28 = vpop.eup %2920 }
 0x2e7   : > { %v1192_v13 = vmul.f32 %v2921_v28, %v2919_v63  ;;  %v4364_v63 = vld [vmem:[#allocation36_spill] sm:$0xff]  ;;  %v4366_v28 = vld [vmem:[#allocation39_spill] sm:$0xff] }
 0x2e9   : > { %v2923_v19 = vpop.eup %2922  ;;  %2200 = vst [vmem:[%s3629_s14 + $0x8] sm:$0xff] %v1192_v13  ;;  %1299 = vmatmul.mubr.f32.vlgmr.msra.gmra.mrb[8].mxu0 %v1192_v13  ;;  %1370 = vmatmul.mubr.f32.vlgmr.msra.gmra.mrb[8].mxu1 %v1192_v13  ;;  %v4368_v13 = vld [vmem:[#allocation40_spill] sm:$0xff] }
 0x2ea   : > { %v1203_v47 = vadd.f32 1.0, %v2923_v19  ;;  %v2925_v45 = vpop.eup %2924  ;;  %2560 = vmatpush1.bf16.msra.mxu0 %v3729_v62  ;;  %2592 = vmatpush1.bf16.msra.mxu1 %v3748_v35  ;;  %v4369_v19 = vld [vmem:[#allocation46_spill] sm:$0xff] }
 0x2eb   : > { %v1204_v30 = vadd.f32 1.0, %v2925_v45  ;;  %2562 = vmatprep.subr.bf16.mxu0 %v3732_v0  ;;  %2594 = vmatprep.subr.bf16.mxu1 %v3751_v39  ;;  %v2927_v53 = vpop.eup %2926  ;;  %v4371_v45 = vld [vmem:[#allocation47_spill] sm:$0xff] }
 0x2ec   : > { %2930 = vrcp.f32 %v1203_v47  ;;  %1452 = vmatprep.mubr.f32.mxu0 %v4330_v58  ;;  %1523 = vmatprep.mubr.f32.mxu1 %v4330_v58  ;;  %v2929_v31 = vpop.eup %2928  ;;  %v4370_v47 = vld [vmem:[#allocation43_spill] sm:$0xff] }
 0x2ed   : > { %2932 = vrcp.f32 %v1204_v30  ;;  %v1205_v59 = vadd.f32 1.0, %v2929_v31  ;;  %v4372_v30 = vld [vmem:[#allocation44_spill] sm:$0xff]  ;;  %v2202_v31 = vld [vmem:[%s3602_s7 + $0x20] sm:$0xff] }
 0x2ee   : > { %2564 = vmatpush1.bf16.msra.mxu0 %v3741_v22  ;;  %2596 = vmatpush1.bf16.msra.mxu1 %v3760_v60 }
 0x2ef   : > { %2566 = vmatprep.subr.bf16.mxu0 %v3745_v24  ;;  %2598 = vmatprep.subr.bf16.mxu1 %v3763_v3  ;;  %2934 = vrcp.f32 %v1205_v59 }
 0x2f2   : > { %2568 = vmatpush1.bf16.msra.mxu0 %v3754_v50  ;;  %2600 = vmatpush1.bf16.msra.mxu1 %v4331_v6 }
 0x2f3   : > { %2570 = vmatprep.subr.bf16.mxu0 %v4332_v11  ;;  %2602 = vmatprep.subr.bf16.mxu1 %v4333_v52 }
 0x2f6   : > { %v2931_v54 = vpop.eup %2930  ;;  %2572 = vmatpush1.bf16.msra.mxu0 %v4334_v57  ;;  %2604 = vmatpush1.bf16.msra.mxu1 %v4335_v29 }
 0x2f7   : > { %v1214_v14 = vmul.f32 %v2931_v54, %v2927_v53  ;;  %v2933_v5 = vpop.eup %2932  ;;  %2574 = vmatprep.subr.bf16.mxu0 %v4336_v48  ;;  %2606 = vmatprep.subr.bf16.mxu1 %v4337_v42  ;;  %v4373_v53 = vld [vmem:[#allocation48_spill] sm:$0xff]  ;;  %v1229_v54 = vunpack.c.l.bf16 %v2202_v31 }
 0x2f8   : > { %v1213_v16 = vmul.f32 %v2933_v5, %v3892_v51 }
 0x2f9   : > { %v2935_v51 = vpop.eup %2934 }
 0x2fa   : > { %v3974_v56 = vadd.f32 %v1214_v14, %v1213_v16  ;;  %2576 = vmatpush1.bf16.msra.mxu0 %v4338_v44  ;;  %2608 = vmatpush1.bf16.msra.mxu1 %v3797_v40  ;;  %v1230_v14 = vunpack.c.h.bf16 %v2202_v31 }
 0x2fb   : > { %2578 = vmatprep.subr.bf16.mxu0 %v4339_v36  ;;  %2610 = vmatprep.subr.bf16.mxu1 %v3800_v55 }
 0x2fc   : > { %2936 = vtanh.f32 %v3974_v56 }
 0x2fe   : > { %2580 = vmatpush1.bf16.msra.mxu0 %v4340_v33  ;;  %2612 = vmatpush1.bf16.msra.mxu1 %v3809_v17 }
 0x2ff   : > { %2582 = vmatprep.subr.bf16.mxu0 %v3794_v37  ;;  %2614 = vmatprep.subr.bf16.mxu1 %v3812_v21 }
 0x302   : > { %2584 = vmatpush1.bf16.msra.mxu0 %v3803_v12  ;;  %2616 = vmatpush1.bf16.msra.mxu1 %v3819_v41 }
 0x303   : > { %2586 = vmatprep.subr.bf16.mxu0 %v3806_v61  ;;  %2618 = vmatprep.subr.bf16.mxu1 %v3822_v32 }
 0x306   : > { %v2937_v1 = vpop.eup %2936  ;;  %2588 = vmatpush1.bf16.msra.mxu0 %v3815_v20  ;;  %2620 = vmatpush1.bf16.msra.mxu1 %v3826_v2 }
 0x307   : > { %v1217_v25 = vmul.f32 %v2937_v1, %v2935_v51  ;;  %2622 = vmatprep.subr.bf16.mxu0 %v3634_v4  ;;  %2654 = vmatprep.subr.bf16.mxu1 %v3649_v23  ;;  %v4352_v4 = vld [vmem:[#allocation27_spill] sm:$0xff]  ;;  %v4355_v23 = vld [vmem:[#allocation33_spill] sm:$0xff] }
 0x309   : > { %2201 = vst [vmem:[%s3631_s30 + $0x10] sm:$0xff] %v1217_v25  ;;  %1453 = vmatmul.mubr.f32.vlgmr.msra.gmra.mrb[10].mxu0 %v1217_v25  ;;  %1524 = vmatmul.mubr.f32.vlgmr.msra.gmra.mrb[10].mxu1 %v1217_v25  ;;  %v2203_v25 = vld [vmem:[%s3602_s7 + $0x28] sm:$0xff] }
 0x30a   : > { %2624 = vmatpush1.bf16.msra.mxu0 %v3638_v9  ;;  %2656 = vmatpush1.bf16.msra.mxu1 %v3651_v26  ;;  %v4353_v9 = vld [vmem:[#allocation30_spill] sm:$0xff]  ;;  %v4356_v26 = vld [vmem:[#allocation29_spill] sm:$0xff] }
 0x30b   : > { %2626 = vmatprep.subr.bf16.mxu0 %v3640_v10  ;;  %2658 = vmatprep.subr.bf16.mxu1 %v3661_v34  ;;  %v4354_v10 = vld [vmem:[#allocation28_spill] sm:$0xff]  ;;  %v4358_v34 = vld [vmem:[#allocation31_spill] sm:$0xff] }
 0x30c   : > { %1664 = vmatprep.mubr.f32.mxu0 %v4330_v58  ;;  %1735 = vmatprep.mubr.f32.mxu1 %v4330_v58 }
 0x30e   : > { %2628 = vmatpush1.bf16.msra.mxu0 %v3644_v15  ;;  %2660 = vmatpush1.bf16.msra.mxu1 %v3663_v38  ;;  %v4357_v15 = vld [vmem:[#allocation34_spill] sm:$0xff] }
 0x30f   : > { %2630 = vmatprep.subr.bf16.mxu0 %v3647_v18  ;;  %2662 = vmatprep.subr.bf16.mxu1 %v3669_v46  ;;  %v4359_v18 = vld [vmem:[#allocation37_spill] sm:$0xff]  ;;  %v4361_v38 = vld [vmem:[#allocation38_spill] sm:$0xff]  ;;  %v4362_v46 = vld [vmem:[#allocation35_spill] sm:$0xff] }
 0x312   : > { %2632 = vmatpush1.bf16.msra.mxu0 %v3654_v27  ;;  %2664 = vmatpush1.bf16.msra.mxu1 %v3675_v49  ;;  %v4360_v27 = vld [vmem:[#allocation32_spill] sm:$0xff]  ;;  %v4363_v49 = vld [vmem:[#allocation41_spill] sm:$0xff] }
 0x313   : > { %2634 = vmatprep.subr.bf16.mxu0 %v4352_v4  ;;  %2666 = vmatprep.subr.bf16.mxu1 %v4353_v9 }
 0x316   : > { %2636 = vmatpush1.bf16.msra.mxu0 %v4354_v10  ;;  %2668 = vmatpush1.bf16.msra.mxu1 %v4355_v23  ;;  %v1231_v23 = vunpack.c.l.bf16 %v2203_v25 }
 0x317   : > { %2638 = vmatprep.subr.bf16.mxu0 %v4356_v26  ;;  %2670 = vmatprep.subr.bf16.mxu1 %v4357_v15  ;;  %v1232_v26 = vunpack.c.h.bf16 %v2203_v25 }
 0x31a   : > { %2640 = vmatpush1.bf16.msra.mxu0 %v4358_v34  ;;  %2672 = vmatpush1.bf16.msra.mxu1 %v4359_v18 }
 0x31b   : > { %2642 = vmatprep.subr.bf16.mxu0 %v4360_v27  ;;  %2674 = vmatprep.subr.bf16.mxu1 %v4361_v38 }
 0x31e   : > { %2644 = vmatpush1.bf16.msra.mxu0 %v4362_v46  ;;  %2676 = vmatpush1.bf16.msra.mxu1 %v4363_v49 }
 0x31f   : > { %2646 = vmatprep.subr.bf16.mxu0 %v4364_v63  ;;  %2678 = vmatprep.subr.bf16.mxu1 %v4365_v8  ;;  %v2204_v8 = vld [vmem:[%s3613_s2 + $0x10] sm:$0xff] }
 0x322   : > { %2648 = vmatpush1.bf16.msra.mxu0 %v4366_v28  ;;  %2680 = vmatpush1.bf16.msra.mxu1 %v4367_v7 }
 0x323   : > { %2650 = vmatprep.subr.bf16.mxu0 %v4368_v13  ;;  %2682 = vmatprep.subr.bf16.mxu1 %v4369_v19  ;;  %v1383_v19 = vunpack.c.l.bf16 %v2204_v8 }
 0x326   : > { %2652 = vmatpush1.bf16.msra.mxu0 %v4370_v47  ;;  %2684 = vmatpush1.bf16.msra.mxu1 %v4371_v45 }
 0x327   : > { %2686 = vmatprep.subr.bf16.mxu0 %v4372_v30  ;;  %2718 = vmatprep.subr.bf16.mxu1 %v4373_v53  ;;  %v1384_v30 = vunpack.c.h.bf16 %v2204_v8  ;;  %v1746_v8 = vld [vmem:[%s3613_s2] sm:$0xff] }
 0x3bc   : > { %v1300_v5 = vpop.f32.mrb[8].mxu0  ;;  %v1371_v59 = vpop.f32.mrb[8].mxu1 }
 0x3bd   : > { %v1376_v16 = vadd.f32 %v1300_v5, %v1229_v54  ;;  %v1302_v51 = vpop.f32.mrb[9].mxu0  ;;  %v1373_v1 = vpop.f32.mrb[9].mxu1  ;;  %v1378_v15 = vadd.f32 %v1371_v59, %v1231_v23 }
 0x3be   : > { %v1377_v4 = vadd.f32 %v1302_v51, %v1230_v14  ;;  %v1379_v34 = vadd.f32 %v1373_v1, %v1232_v26  ;;  %v2205_v51 = vld [vmem:[%s3613_s2 + $0x18] sm:$0xff] }
 0x3bf   : > { %v2206_v9 = vmul.f32 -1.442695, %v1376_v16  ;;  %v2208_v18 = vmul.f32 -1.442695, %v1378_v15 }
 0x3c0   : > { %v2207_v10 = vmul.f32 -1.442695, %v1377_v4 }
 0x3c1   : > { %2938 = vpow2.f32 %v2206_v9  ;;  %v1385_v9 = vunpack.c.l.bf16 %v2205_v51 }
 0x3c2   : > { %2940 = vpow2.f32 %v2207_v10  ;;  %v1386_v10 = vunpack.c.h.bf16 %v2205_v51 }
 0x3c3   : > { %2942 = vtanh.f32 %v1379_v34 }
 0x3c4   : > { %2944 = vpow2.f32 %v2208_v18 }
 0x3cb   : > { %v2939_v27 = vpop.eup %2938 }
 0x3cc   : > { %v1544_v38 = vadd.f32 1.0, %v2939_v27  ;;  %v2941_v46 = vpop.eup %2940 }
 0x3cd   : > { %v1545_v49 = vadd.f32 1.0, %v2941_v46  ;;  %v2943_v63 = vpop.eup %2942 }
 0x3ce   : > { %2946 = vrcp.f32 %v1544_v38  ;;  %v2945_v28 = vpop.eup %2944 }
 0x3cf   : > { %2948 = vrcp.f32 %v1545_v49  ;;  %v1546_v45 = vadd.f32 1.0, %v2945_v28 }
 0x3d1   : > { %2950 = vrcp.f32 %v1546_v45 }
 0x3d8   : > { %v2947_v7 = vpop.eup %2946 }
 0x3d9   : > { %v1555_v13 = vmul.f32 %v2947_v7, %v2943_v63  ;;  %v2949_v47 = vpop.eup %2948 }
 0x3da   : > { %v1554_v53 = vmul.f32 %v2949_v47, %v3950_v43 }
 0x3db   : > { %v2951_v23 = vpop.eup %2950 }
 0x3dc   : > { %v1454_v31 = vpop.f32.mrb[10].mxu0  ;;  %v1525_v54 = vpop.f32.mrb[10].mxu1  ;;  %v4032_v14 = vadd.f32 %v1555_v13, %v1554_v53 }
 0x3dd   : > { %v1530_v5 = vadd.f32 %v1454_v31, %v1383_v19  ;;  %v1456_v59 = vpop.f32.mrb[11].mxu0  ;;  %v1527_v16 = vpop.f32.mrb[11].mxu1  ;;  %v1532_v43 = vadd.f32 %v1525_v54, %v1385_v9  ;;  %v1748_v19 = vunpack.c.l.bf16 %v1746_v8 }
 0x3de   : > { %v1531_v1 = vadd.f32 %v1456_v59, %v1384_v30  ;;  %2952 = vtanh.f32 %v4032_v14  ;;  %v1533_v26 = vadd.f32 %v1527_v16, %v1386_v10  ;;  %v1749_v30 = vunpack.c.h.bf16 %v1746_v8 }
 0x3df   : > { %v2209_v25 = vmul.f32 -1.442695, %v1530_v5  ;;  %v2211_v34 = vmul.f32 -1.442695, %v1532_v43 }
 0x3e0   : > { %v2210_v4 = vmul.f32 -1.442695, %v1531_v1  ;;  %v1747_v1 = vld [vmem:[%s3613_s2 + $0x8] sm:$0xff]  ;;  %s3124_s2 = scalar_lea.vmem %s3123_s9, 1024 }
 0x3e1   : > { %2954 = vpow2.f32 %v2209_v25  ;;  %v1750_v10 = vunpack.c.l.bf16 %v1747_v1  ;;  %p3126_p4 = scmp.lt.s32.totalorder %s3124_s2, %s3118_s8 }
 0x3e2   : > { %2956 = vpow2.f32 %v2210_v4 }
 0x3e3   : > { %2958 = vtanh.f32 %v1533_v26  ;;  %p3127_p8 = por %p3126_p4, %p3125_p13 }
 0x3e4   : > { %2960 = vpow2.f32 %v2211_v34 }
 0x3e5   : > { %p3128_p5 = pnand %p3127_p8, %p3121_p6 }
 0x3e8   : > { %v2953_v15 = vpop.eup %2952 }
 0x3e9   : > { %v1558_v18 = vmul.f32 %v2953_v15, %v2951_v23 }
 0x3eb   : > { %v2955_v27 = vpop.eup %2954  ;;  %2212 = vst [vmem:[%s3629_s14 + $0x10] sm:$0xff] %v1558_v18  ;;  %1665 = vmatmul.mubr.f32.vlgmr.msra.gmra.mrb[12].mxu0 %v1558_v18  ;;  %1736 = vmatmul.mubr.f32.vlgmr.msra.gmra.mrb[12].mxu1 %v1558_v18 }
 0x3ec   : > { %v1569_v38 = vadd.f32 1.0, %v2955_v27  ;;  %v2957_v46 = vpop.eup %2956  ;;  %2688 = vmatpush1.bf16.msra.mxu0 %v3729_v62  ;;  %2720 = vmatpush1.bf16.msra.mxu1 %v3748_v35 }
 0x3ed   : > { %v1570_v49 = vadd.f32 1.0, %v2957_v46  ;;  %2690 = vmatprep.subr.bf16.mxu0 %v3732_v0  ;;  %2722 = vmatprep.subr.bf16.mxu1 %v3751_v39  ;;  %v2959_v62 = vpop.eup %2958 }
 0x3ee   : > { %2962 = vrcp.f32 %v1569_v38  ;;  %1817 = vmatprep.mubr.f32.mxu0 %v4330_v58  ;;  %1888 = vmatprep.mubr.f32.mxu1 %v4330_v58  ;;  %v2961_v0 = vpop.eup %2960 }
 0x3ef   : > { %2964 = vrcp.f32 %v1570_v49 }
 0x3f0   : > { %2692 = vmatpush1.bf16.msra.mxu0 %v3741_v22  ;;  %2724 = vmatpush1.bf16.msra.mxu1 %v3760_v60 }
 0x3f1   : > { %2694 = vmatprep.subr.bf16.mxu0 %v3745_v24  ;;  %2726 = vmatprep.subr.bf16.mxu1 %v3763_v3  ;;  %v1571_v24 = vadd.f32 1.0, %v2961_v0 }
 0x3f3   : > { %2966 = vrcp.f32 %v1571_v24 }
 0x3f4   : > { %2696 = vmatpush1.bf16.msra.mxu0 %v3754_v50  ;;  %2728 = vmatpush1.bf16.msra.mxu1 %v4331_v6 }
 0x3f5   : > { %2698 = vmatprep.subr.bf16.mxu0 %v4332_v11  ;;  %2730 = vmatprep.subr.bf16.mxu1 %v4333_v52 }
 0x3f8   : > { %v2963_v35 = vpop.eup %2962  ;;  %2700 = vmatpush1.bf16.msra.mxu0 %v4334_v57  ;;  %2732 = vmatpush1.bf16.msra.mxu1 %v4335_v29 }
 0x3f9   : > { %v1580_v39 = vmul.f32 %v2963_v35, %v2959_v62  ;;  %v2965_v22 = vpop.eup %2964  ;;  %2702 = vmatprep.subr.bf16.mxu0 %v4336_v48  ;;  %2734 = vmatprep.subr.bf16.mxu1 %v4337_v42 }
 0x3fa   : > { %v1579_v50 = vmul.f32 %v2965_v22, %v3974_v56 }
 0x3fc   : > { %v4056_v60 = vadd.f32 %v1580_v39, %v1579_v50  ;;  %2704 = vmatpush1.bf16.msra.mxu0 %v4338_v44  ;;  %2736 = vmatpush1.bf16.msra.mxu1 %v3797_v40 }
 0x3fd   : > { %2706 = vmatprep.subr.bf16.mxu0 %v4339_v36  ;;  %2738 = vmatprep.subr.bf16.mxu1 %v3800_v55  ;;  %v2967_v3 = vpop.eup %2966 }
 0x3fe   : > { %2968 = vtanh.f32 %v4056_v60 }
 0x400   : > { %2708 = vmatpush1.bf16.msra.mxu0 %v4340_v33  ;;  %2740 = vmatpush1.bf16.msra.mxu1 %v3809_v17 }
 0x401   : > { %2710 = vmatprep.subr.bf16.mxu0 %v3794_v37  ;;  %2742 = vmatprep.subr.bf16.mxu1 %v3812_v21  ;;  %v2214_v37 = vld [vmem:[%s3602_s7 + $0x30] sm:$0xff] }
 0x402   : > { %v1595_v17 = vunpack.c.l.bf16 %v2214_v37 }
 0x404   : > { %2712 = vmatpush1.bf16.msra.mxu0 %v3803_v12  ;;  %2744 = vmatpush1.bf16.msra.mxu1 %v3819_v41  ;;  %v1596_v12 = vunpack.c.h.bf16 %v2214_v37 }
 0x405   : > { %2714 = vmatprep.subr.bf16.mxu0 %v3806_v61  ;;  %2746 = vmatprep.subr.bf16.mxu1 %v3822_v32  ;;  %v2215_v32 = vld [vmem:[%s3602_s7 + $0x38] sm:$0xff]  ;;  %s1957_s7 = scalar_lea.sflag [#allocation8], %s3598_s21 }
 0x408   : > { %v2969_v40 = vpop.eup %2968  ;;  %2716 = vmatpush1.bf16.msra.mxu0 %v3815_v20  ;;  %2748 = vmatpush1.bf16.msra.mxu1 %v3826_v2  ;;  %v1597_v20 = vunpack.c.l.bf16 %v2215_v32  ;;  %v1598_v2 = vunpack.c.h.bf16 %v2215_v32 }
 0x409   : > { %v1583_v55 = vmul.f32 %v2969_v40, %v2967_v3 }
 0x40b   : > { %2213 = vst [vmem:[%s3631_s30 + $0x8] sm:$0xff] %v1583_v55  ;;  %1818 = vmatmul.mubr.f32.vlgmr.msra.gmra.mrb[14].mxu0 %v1583_v55  ;;  %1889 = vmatmul.mubr.f32.vlgmr.msra.gmra.mrb[14].mxu1 %v1583_v55 }
 0x4be   : > { %v1666_v21 = vpop.f32.mrb[12].mxu0  ;;  %v1737_v41 = vpop.f32.mrb[12].mxu1 }
 0x4bf   : > { %v1742_v58 = vadd.f32 %v1666_v21, %v1595_v17  ;;  %v1668_v61 = vpop.f32.mrb[13].mxu0  ;;  %v1739_v6 = vpop.f32.mrb[13].mxu1  ;;  %v1744_v29 = vadd.f32 %v1737_v41, %v1597_v20 }
 0x4c0   : > { %v1743_v11 = vadd.f32 %v1668_v61, %v1596_v12  ;;  %v1745_v48 = vadd.f32 %v1739_v6, %v1598_v2 }
 0x4c1   : > { %v2216_v52 = vmul.f32 -1.442695, %v1742_v58  ;;  %v2218_v42 = vmul.f32 -1.442695, %v1744_v29 }
 0x4c2   : > { %v2217_v57 = vmul.f32 -1.442695, %v1743_v11 }
 0x4c3   : > { %2970 = vpow2.f32 %v2216_v52 }
 0x4c4   : > { %2972 = vpow2.f32 %v2217_v57 }
 0x4c5   : > { %2974 = vtanh.f32 %v1745_v48 }
 0x4c6   : > { %2976 = vpow2.f32 %v2218_v42 }
 0x4cd   : > { %v2971_v44 = vpop.eup %2970 }
 0x4ce   : > { %v1909_v36 = vadd.f32 1.0, %v2971_v44  ;;  %v2973_v33 = vpop.eup %2972 }
 0x4cf   : > { %v1910_v56 = vadd.f32 1.0, %v2973_v33  ;;  %v2975_v63 = vpop.eup %2974 }
 0x4d0   : > { %2978 = vrcp.f32 %v1909_v36  ;;  %v2977_v28 = vpop.eup %2976 }
 0x4d1   : > { %2980 = vrcp.f32 %v1910_v56  ;;  %v1911_v45 = vadd.f32 1.0, %v2977_v28 }
 0x4d3   : > { %2982 = vrcp.f32 %v1911_v45 }
 0x4da   : > { %v2979_v7 = vpop.eup %2978 }
 0x4db   : > { %v1920_v13 = vmul.f32 %v2979_v7, %v2975_v63  ;;  %v2981_v47 = vpop.eup %2980 }
 0x4dc   : > { %v1919_v53 = vmul.f32 %v2981_v47, %v4032_v14  ;;  %v1751_v14 = vunpack.c.h.bf16 %v1747_v1 }
 0x4dd   : > { %v2983_v23 = vpop.eup %2982 }
 0x4de   : > { %v1819_v31 = vpop.f32.mrb[14].mxu0  ;;  %v1890_v54 = vpop.f32.mrb[14].mxu1  ;;  %v1921_v5 = vadd.f32 %v1920_v13, %v1919_v53 }
 0x4df   : > { %v1895_v59 = vadd.f32 %v1819_v31, %v1748_v19  ;;  %v1821_v16 = vpop.f32.mrb[15].mxu0  ;;  %v1892_v51 = vpop.f32.mrb[15].mxu1  ;;  %v1897_v43 = vadd.f32 %v1890_v54, %v1750_v10 }
 0x4e0   : > { %v1896_v25 = vadd.f32 %v1821_v16, %v1749_v30  ;;  %2984 = vtanh.f32 %v1921_v5  ;;  %1950 = vst [vmem:[#allocation3] sm:$0xff] %v1921_v5  ;;  %v1898_v26 = vadd.f32 %v1892_v51, %v1751_v14 }
 0x4e1   : > { %v2219_v4 = vmul.f32 -1.442695, %v1895_v59  ;;  %v2221_v34 = vmul.f32 -1.442695, %v1897_v43 }
 0x4e2   : > { %v2220_v9 = vmul.f32 -1.442695, %v1896_v25 }
 0x4e3   : > { %2986 = vpow2.f32 %v2219_v4 }
 0x4e4   : > { %2988 = vpow2.f32 %v2220_v9 }
 0x4e5   : > { %2990 = vtanh.f32 %v1898_v26 }
 0x4e6   : > { %2992 = vpow2.f32 %v2221_v34 }
 0x4ea   : > { %v2985_v15 = vpop.eup %2984 }
 0x4eb   : > { %v1923_v18 = vmul.f32 %v2985_v15, %v2983_v23 }
 0x4ed   : > { %v2987_v27 = vpop.eup %2986  ;;  %1949 = vst [vmem:[#allocation2] sm:$0xff] %v1923_v18  ;;  %2222 = vst [vmem:[%s3629_s14 + $0x18] sm:$0xff] %v1923_v18 }
 0x4ee   : > { %v1934_v38 = vadd.f32 1.0, %v2987_v27  ;;  %v2989_v46 = vpop.eup %2988 }
 0x4ef   : > { %3131 = shalt.err (!%p3128_p5)
}
 0x4f0   : > { %s3132_s29 = scalar_lea.hbm %s4084_s12, 512  ;;  %s3136_s27 = scalar_lea.hbm %s4195_s4, 1024 }
 0x4f1   : > { %p3133_p11 = scmp.ne.s32.totalorder %s4084_s12, %s3132_s29  ;;  %p3137_p9 = scmp.lt.u32.totalorder %s4084_s12, %s4195_s4 }
 0x4f2   : > { %p3138_p10 = scmp.lt.u32.totalorder %s3136_s27, %s3132_s29  ;;  %p3140_p1 = scmp.lt.u32.totalorder %s3132_s29, %s4084_s12 }
 0x4f3   : > { %p3134_p12 = pnand %p3133_p11, %p4374_p2 }
 0x4f4   : > { %p3139_p0 = por %p3138_p10, %p3137_p9 }
 0x4f5   : > { %p3135_p3 = pneg %p3134_p12 }
 0x4f6   : > { %p3141_p7 = por %p3140_p1, %p3139_p0 }
 0x4f8   : > { %p3142_p6 = pnand %p3141_p7, %p3135_p3 }
 0x4fa   : > { %3145 = shalt.err (!%p3142_p6)
}
 0x4fb   : > { %s3281_s8 = smov 128   ;;  %s3282_s15 = smov 8   ;;  %2994 = vrcp.f32 %v1934_v38  ;;  %v1935_v49 = vadd.f32 1.0, %v2989_v46  ;;  %v2991_v62 = vpop.eup %2990 }
 0x4fc   : > { %2761 = dma.vmem_to_hbm [thread:$0]  (%p4374_p2), %s4086_s18, 512, %s4084_s12, %s1957_s7, %s3281_s8, %s3281_s8, %s3282_s15   ;;  %v2993_v0 = vpop.eup %2992 }
 0x4fd   : > { %2996 = vrcp.f32 %v1935_v49  ;;  %v1936_v24 = vadd.f32 1.0, %v2993_v0  ;;  %s1986_s16 = ssub.s32 1, %s3260_s24  ;;  %s1994_s18 = sshll.u32 %s3631_s30, 4  ;;  %s4124_s18 = int_to_ptr.vmem [resolvable:$true] %s1994_s18 }
 0x4fe   : > { %s2236_s21 = sshll.u32 %s1986_s16, 9  ;;  %s1962_s2 = scalar_lea.sflag [#allocation16], %s3610_s28 }
 0x4ff   : > { %2998 = vrcp.f32 %v1936_v24  ;;  %s4122_s9 = scalar_lea.hbm %s4196_s5, %s2236_s21  ;;  %s3146_s29 = scalar_lea.vmem %s4124_s18, 512 }
 0x500   : > { %p3147_p2 = scmp.ne.s32.totalorder %s4124_s18, %s3146_s29  ;;  %p4375_p13 = scmp.ne.s32.totalorder %s4287_s0, 0 }
 0x501   : > { %s3283_s24 = smov [#allocation15]  }
 0x502   : > { %p3148_p4 = pnand %p3147_p2, %p4375_p13  ;;  %s3150_s3 = sshll.u32 %s3283_s24, 4  ;;  %s3151_s3 = int_to_ptr.vmem [resolvable:$false] %s3150_s3 }
 0x503   : > { %s3152_s14 = scalar_lea.vmem %s3151_s3, 1024  ;;  %p3153_p5 = scmp.lt.s32.totalorder %s4124_s18, %s3151_s3 }
 0x504   : > { %p3149_p8 = pneg %p3148_p4  ;;  %p3154_p11 = scmp.lt.s32.totalorder %s3152_s14, %s3146_s29 }
 0x505   : > { %v2995_v35 = vpop.eup %2994 }
 0x506   : > { %v1945_v39 = vmul.f32 %v2995_v35, %v2991_v62  ;;  %p3155_p12 = por %p3154_p11, %p3153_p5 }
 0x507   : > { %v2997_v22 = vpop.eup %2996 }
 0x508   : > { %v1944_v50 = vmul.f32 %v2997_v22, %v4056_v60  ;;  %p3156_p3 = pnand %p3155_p12, %p3149_p8 }
 0x509   : > { %v2999_v40 = vpop.eup %2998 }
 0x50a   : > { %v1946_v3 = vadd.f32 %v1945_v39, %v1944_v50 }
 0x50c   : > { %3000 = vtanh.f32 %v1946_v3  ;;  %1952 = vst [vmem:[#allocation5] sm:$0xff] %v1946_v3 }
 0x516   : > { %v3001_v55 = vpop.eup %3000 }
 0x517   : > { %v1948_v37 = vmul.f32 %v3001_v55, %v2999_v40 }
 0x519   : > { %1951 = vst [vmem:[#allocation4] sm:$0xff] %v1948_v37  ;;  %1955 = vst [vmem:[%s3631_s30] sm:$0xff] %v1948_v37 }
 0x51a   : > { %3159 = shalt.err (!%p3156_p3)
}
 0x51b   : > { %s3160_s30 = scalar_lea.hbm %s4122_s9, 512  ;;  %s3164_s11 = scalar_lea.hbm %s4196_s5, 1024 }
 0x51c   : > { %p3161_p9 = scmp.ne.s32.totalorder %s4122_s9, %s3160_s30  ;;  %p3165_p1 = scmp.lt.u32.totalorder %s4122_s9, %s4196_s5 }
 0x51d   : > { %p3166_p7 = scmp.lt.u32.totalorder %s3164_s11, %s3160_s30  ;;  %p3168_p2 = scmp.lt.u32.totalorder %s3160_s30, %s4122_s9 }
 0x51e   : > { %p3162_p10 = pnand %p3161_p9, %p4375_p13 }
 0x51f   : > { %p3167_p6 = por %p3166_p7, %p3165_p1 }
 0x520   : > { %p3163_p0 = pneg %p3162_p10 }
 0x521   : > { %p3169_p4 = por %p3168_p2, %p3167_p6 }
 0x523   : > { %p3170_p8 = pnand %p3169_p4, %p3163_p0 }
 0x525   : > { %3173 = shalt.err (!%p3170_p8)
}
 0x526   : > { %2762 = dma.vmem_to_hbm [thread:$0]  (%p4375_p13), %s4124_s18, 512, %s4122_s9, %s1962_s2, %s3281_s8, %s3281_s8, %s3282_s15  }
 0x527 PF: > { %s4376_s12 = sld [smem:[#allocation24_spill]]  ;;  %s4377_s7 = sld [smem:[#allocation25_spill]] }
 0x528   : > { %p4379_p11 = scmp.ge.s32.totalorder %s3268_s26, 2 }
 0x52d   : > { %s2009_s29 = sand.u32 1, %s4376_s12   ;;  %p4378_p5 = scmp.ne.s32.totalorder %s4377_s7, 0 }
 0x52e   : > { %s2010_s24 = scalar_lea.sflag [#allocation8], %s2009_s29 }
 0x52f   : > { %p2780_p12 = pnand %p4379_p11, %p4378_p5 }
 0x531   : > { %3227 = dma.done.wait (!%p2780_p12), %s2010_s24, 512  }
 0x532   : > { %3229 = vsyncadd (!%p2780_p12), %s2010_s24, 4294966784  ;;  %s4380_s0 = sld [smem:[#allocation23_spill]]  ;;  %s4381_s3 = sld [smem:[#allocation26_spill]] }
 0x533   : > { %p4383_p9 = pmov %p4379_p11 }
 0x538   : > { %s2018_s14 = sand.u32 1, %s4380_s0   ;;  %p4382_p3 = scmp.ne.s32.totalorder %s4381_s3, 0 }
 0x539   : > { %s2019_s28 = scalar_lea.sflag [#allocation16], %s2018_s14 }
 0x53a   : > { %p2783_p10 = pnand %p4383_p9, %p4382_p3 }
 0x53c   : > { %3231 = dma.done.wait (!%p2783_p10), %s2019_s28, 512  }
 0x53d   : > { %3233 = vsyncadd (!%p2783_p10), %s2019_s28, 4294966784  ;;  %s29_s26 = sadd.s32 1, %s3268_s26   ;;  %s4384_s18 = smov %s3240_s19 }
 0x53e   : > { %p26_p13 = scmp.ge.s32.totalorder %s29_s26, 4   ;;  %s4385_s19 = smov %s3244_s20 }
 0x53f   : > { %s4386_s20 = smov %s3548_s13  ;;  %s4387_s21 = smov %s3252_s22 }
 0x540   : > { %s4388_s22 = smov %s3256_s23  ;;  %s4389_s23 = smov %s3484_s17 }
 0x541   : > { %s4390_s24 = smov %s3264_s25  ;;  %s4391_s25 = smov %s4393_s6 }
 0x542   :  { %28 = sbr.rel (!%p26_p13) target bundleno = 17 (0x11), region = 135 }
 0x549   :  { %2024 = vsyncpa [#allocation7], 1 }
 0x54a   :  { %2026 = vsyncpa [#allocation7 + $0x1], 1 }
 0x54b   :  { %2027 = vsyncpa [#allocation10], 1 }
 0x54c   :  { %2029 = vsyncpa [#allocation10 + $0x1], 1 }
 0x54d   :  { %2030 = vsyncpa [#allocation13], 1 }
 0x54e   :  { %2031 = vsyncpa [#allocation8], 1 }
 0x54f   :  { %2033 = vsyncpa [#allocation8 + $0x1], 1 }
 0x550   :  { %2034 = vsyncpa [#allocation16], 1 }
 0x551   :  { %2036 = vsyncpa [#allocation16 + $0x1], 1 }

</bundles_post_ra>
